<compile_context>
chip_gen: v7x
topology: tpu7x:2x2x1
jax: 0.10.0
libtpu: 0.0.40
codegen_flags: <defaults>
</compile_context>

<pallas_src>
import functools

import jax
import jax.numpy as jnp
from jax.experimental import pallas as pl
from jax.experimental.pallas import tpu as pltpu


def _round_up(x, m):
    return -(-x // m) * m


def _gmm_tile_kernel(x_ref, r_ref, bias_ref, pool_ref, logc_ref, out_ref, *,
                     n_samples, samples_per_row, n_clusters, rows_per_tile):
    """Per-tile partial logsumexp of the per-(sample, cluster) log joint density.

    Packed layout: each 128-lane row of x_ref holds `samples_per_row` samples of D dims
    (lane l -> sample slot l // D, dim l % D), so the DMA and every intermediate stay
    lane-dense.

    x_ref:    (TR, 128)        packed sample tile (TR rows * P samples/row)
    r_ref:    (128, P*K*D)     kron(I_P, Linv_stacked^T): per-slot stacked whitening
    bias_ref: (1,   P*K*D)     tiled  -Linv_k @ mu_k
    pool_ref: (P*K*D, P*K)     block-diagonal ones: per-(slot, cluster) sum of squares
    logc_ref: (1,   P*K)       tiled  log softmax(w)_k - 0.5*(D log 2pi + logdet sigma_k)
    out_ref:  (1, 1, 128)      per-tile partial logsumexp, replicated across lanes
    """
    i = pl.program_id(0)
    x = x_ref[...]                                                     # (TR, 128)

    # v[r, s*K*D + k*D + d'] = (Linv_k @ (x_n - mu_k))[d'],  n = (i*TR + r)*P + s
    v = jnp.dot(x, r_ref[...], preferred_element_type=jnp.float32) + bias_ref[...]
    # m[r, s*K + k] = || Linv_k (x_n - mu_k) ||^2   (squared Mahalanobis distance)
    m = jnp.dot(v * v, pool_ref[...], preferred_element_type=jnp.float32)
    t = logc_ref[...] - 0.5 * m                                        # (TR, P*K) log joint

    # Mask packed entries whose global sample index is out of range (ragged tail / OOB
    # rows of the last block).  lane = slot*K + k, so  lane < K*(N - base)  <=>
    # base + slot < N  (handles base >= N and full rows correctly without int division).
    row = jax.lax.broadcasted_iota(jnp.int32, t.shape, 0)
    lane = jax.lax.broadcasted_iota(jnp.int32, t.shape, 1)
    base = (i * rows_per_tile + row) * samples_per_row                 # first sample of this row
    valid = lane < n_clusters * (n_samples - base)
    t = jnp.where(valid, t, -jnp.inf)

    # Tile-level logsumexp over every (sample, cluster) entry.  gmax is finite because
    # every tile contains at least one in-range sample, so exp(-inf - gmax) == 0 (no NaN).
    gmax = jnp.max(jnp.max(t, axis=1, keepdims=True), axis=0, keepdims=True)   # (1, 1)
    e = jnp.exp(t - gmax)
    s = jnp.sum(jnp.sum(e, axis=1, keepdims=True), axis=0, keepdims=True)      # (1, 1)
    partial = gmax + jnp.log(s)
    out_ref[...] = jnp.broadcast_to(partial.reshape(1, 1, 1), (1, 1, 128))


@functools.partial(jax.jit, static_argnames=("tile_samples",))
def gmm_neglog_likelihood(X, means, chols, weights, *, tile_samples=8192):
    """Pallas-backed equivalent of GaussianMixture.forward(X, it)."""
    X = jnp.asarray(X, jnp.float32)
    means = jnp.asarray(means, jnp.float32)
    chols = jnp.asarray(chols, jnp.float32)
    weights = jnp.asarray(weights, jnp.float32)
    N, D = X.shape
    K = means.shape[0]

    if 128 % D != 0:
        # TODO(synk): generalize the lane-packing to dims that do not divide 128.
        raise NotImplementedError("n_dims must divide 128 for the packed-lane kernel")
    P = 128 // D                                  # samples packed per 128-lane row

    # ---- parameter preprocessing (cheap glue, plain JAX) -----------------------------
    eye = jnp.eye(D, dtype=jnp.float32)
    sigmas = chols @ jnp.swapaxes(chols, -1, -2) + eye                     # (K, D, D)
    L = jnp.linalg.cholesky(sigmas)                                        # (K, D, D)
    Linv = jax.vmap(
        lambda Lk: jax.scipy.linalg.solve_triangular(Lk, eye, lower=True))(L)
    log_det = 2.0 * jnp.sum(jnp.log(jnp.diagonal(L, axis1=-2, axis2=-1)), axis=-1)
    logc = jax.nn.log_softmax(weights) - 0.5 * (D * jnp.log(2.0 * jnp.pi) + log_det)

    W = Linv.reshape(K * D, D)                                             # rows (k,d'), cols d
    b_flat = (-jnp.einsum("kij,kj->ki", Linv, means)).reshape(K * D)       # stacked -Linv mu

    # Block-diagonal constants over the P sample slots of a packed 128-lane row.
    eyeP = jnp.eye(P, dtype=jnp.float32)
    R = jnp.kron(eyeP, W.T)                                                # (128, P*K*D)
    bias_row = jnp.tile(b_flat, P)[None, :]                                # (1, P*K*D)
    pool = jnp.kron(eyeP, jnp.kron(jnp.eye(K, dtype=jnp.float32),
                                   jnp.ones((D, 1), jnp.float32)))         # (P*K*D, P*K)
    logc_row = jnp.tile(logc, P)[None, :]                                  # (1, P*K)

    # ---- pack samples P-per-row (pure bitcast when N % P == 0) ------------------------
    n_rows = -(-N // P)
    if N % P != 0:
        # TODO(synk): tiny pad copy only in the rare N % P != 0 case; padded samples are
        # masked to -inf in-kernel.
        X = jnp.pad(X, ((0, n_rows * P - N), (0, 0)))
    Xp = X.reshape(n_rows, P * D)                                          # (n_rows, 128)

    # ---- tiling (row = P samples); keep >=2 grid steps for v7x's two TensorCores ------
    rows_per_tile = max(8, (int(tile_samples) // P // 8) * 8)              # sublane-aligned
    rows_per_tile = min(rows_per_tile, max(8, (16384 // P // 8) * 8))      # default-VMEM-safe cap
    rows_per_tile = min(rows_per_tile, _round_up(-(-n_rows // 2), 8))      # 2-way split when possible
    rows_per_tile = min(rows_per_tile, _round_up(n_rows, 8))
    grid = -(-n_rows // rows_per_tile)

    kernel = functools.partial(
        _gmm_tile_kernel, n_samples=N, samples_per_row=P, n_clusters=K,
        rows_per_tile=rows_per_tile)

    partials = pl.pallas_call(
        kernel,
        out_shape=jax.ShapeDtypeStruct((grid, 1, 128), jnp.float32),
        grid_spec=pltpu.PrefetchScalarGridSpec(
            num_scalar_prefetch=0,
            grid=(grid,),
            in_specs=[
                pl.BlockSpec((rows_per_tile, P * D), lambda i: (i, 0)),    # packed samples
                pl.BlockSpec((P * D, P * K * D), lambda i: (0, 0)),        # whitening (invariant)
                pl.BlockSpec((1, P * K * D), lambda i: (0, 0)),            # bias (invariant)
                pl.BlockSpec((P * K * D, P * K), lambda i: (0, 0)),        # pooling (invariant)
                pl.BlockSpec((1, P * K), lambda i: (0, 0)),                # log coefficients
            ],
            out_specs=pl.BlockSpec((1, 1, 128), lambda i: (i, 0, 0)),
        ),
        compiler_params=pltpu.CompilerParams(
            dimension_semantics=("parallel",)),
    )(Xp, R, bias_row, pool, logc_row)

    # ---- combine per-tile partials (logsumexp of logsumexps == global logsumexp) ------
    return -(jax.scipy.special.logsumexp(partials[:, 0, 0]) / N)


def _reference_forward(X, means, chols, weights):
    """Pure-JAX reference mirroring the PyTorch module's math, for a sanity check."""
    X = jnp.asarray(X, jnp.float32)
    means = jnp.asarray(means, jnp.float32)
    chols = jnp.asarray(chols, jnp.float32)
    weights = jnp.asarray(weights, jnp.float32)
    N, D = X.shape
    eye = jnp.eye(D, dtype=jnp.float32)
    sigmas = chols @ jnp.swapaxes(chols, -1, -2) + eye
    L = jnp.linalg.cholesky(sigmas)
    diff = X[None, :, :] - means[:, None, :]                               # (K, N, D)
    y = jax.vmap(lambda Lk, dk: jax.scipy.linalg.solve_triangular(
        Lk, dk.T, lower=True))(L, diff)                                    # (K, D, N)
    m = jnp.sum(y * y, axis=1)                                             # (K, N)
    log_det = 2.0 * jnp.sum(jnp.log(jnp.diagonal(L, axis1=-2, axis2=-1)), axis=-1)
    log_coef = jax.nn.log_softmax(weights) - 0.5 * (D * jnp.log(2.0 * jnp.pi) + log_det)
    log_pdf = jax.scipy.special.logsumexp(log_coef[:, None] - 0.5 * m, axis=0)
    return -(jax.scipy.special.logsumexp(log_pdf) / N)


if __name__ == "__main__":
    n_clusters, n_dims, n_samples = 4, 8, 4096

    key = jax.random.PRNGKey(0)
    k_mu, k_ch, k_w, k_x = jax.random.split(key, 4)
    means = jax.random.normal(k_mu, (n_clusters, n_dims), dtype=jnp.float32)
    chols = jax.random.normal(k_ch, (n_clusters, n_dims, n_dims), dtype=jnp.float32)
    weights = jax.random.normal(k_w, (n_clusters,), dtype=jnp.float32)
    X = jax.random.normal(k_x, (n_samples, n_dims), dtype=jnp.float32) * 2.0

    out = jax.block_until_ready(gmm_neglog_likelihood(X, means, chols, weights))
    ref = jax.block_until_ready(_reference_forward(X, means, chols, weights))
    assert out.shape == (), f"expected scalar output, got {out.shape}"
    assert jnp.allclose(out, ref, rtol=2e-4, atol=2e-4), (out, ref)

    # Ragged tail (N not a multiple of the 16-sample packing / tile size) exercises the
    # in-kernel masking path.
    X2 = X[:1000]
    out2 = jax.block_until_ready(gmm_neglog_likelihood(X2, means, chols, weights))
    ref2 = jax.block_until_ready(_reference_forward(X2, means, chols, weights))
    assert jnp.allclose(out2, ref2, rtol=2e-4, atol=2e-4), (out2, ref2)

    print("KERNEL_OK")
</pallas_src>

<mosaic_0001>
module attributes {stable_mosaic.version = 11 : i64} {
  func.func @_gmm_tile_kernel(%arg0: i32, %arg1: memref<128x128xf32, #tpu.memory_space<vmem>>, %arg2: memref<128x512xf32, #tpu.memory_space<vmem>>, %arg3: memref<1x512xf32, #tpu.memory_space<vmem>>, %arg4: memref<512x64xf32, #tpu.memory_space<vmem>>, %arg5: memref<1x64xf32, #tpu.memory_space<vmem>>, %arg6: memref<1x1x128xf32, #tpu.memory_space<vmem>>) attributes {dimension_semantics = [#tpu.dimension_semantics<parallel>], iteration_bounds = array<i64: 2>, scalar_prefetch = 0 : i64, scratch_operands = 0 : i64, tpu.core_type = #tpu.core_type<tc>, window_params = [{transform_indices = @transform_0, window_bounds = array<i64: 128, 128>}, {pipeline_mode = #tpu.pipeline_mode<synchronous>, transform_indices = @transform_1, window_bounds = array<i64: 128, 512>}, {pipeline_mode = #tpu.pipeline_mode<synchronous>, transform_indices = @transform_2, window_bounds = array<i64: 1, 512>}, {pipeline_mode = #tpu.pipeline_mode<synchronous>, transform_indices = @transform_3, window_bounds = array<i64: 512, 64>}, {pipeline_mode = #tpu.pipeline_mode<synchronous>, transform_indices = @transform_4, window_bounds = array<i64: 1, 64>}, {transform_indices = @transform_5, window_bounds = array<i64: 1, 1, 128>}]} {
    %c0 = arith.constant 0 : index
    %c0_0 = arith.constant 0 : index
    %0 = vector.load %arg1[%c0, %c0_0] : memref<128x128xf32, #tpu.memory_space<vmem>>, vector<128x128xf32>
    %c0_1 = arith.constant 0 : index
    %c0_2 = arith.constant 0 : index
    %1 = vector.load %arg2[%c0_1, %c0_2] : memref<128x512xf32, #tpu.memory_space<vmem>>, vector<128x512xf32>
    %cst = arith.constant dense<0.000000e+00> : vector<128x512xf32>
    %2 = tpu.matmul %0, %1, %cst {dimension_numbers = #tpu.dot_dimension_numbers<[1], [0], [0], [1], [0, 0, 1, 1], [], []>} : vector<128x128xf32>, vector<128x512xf32>, vector<128x512xf32> -> vector<128x512xf32>
    %c0_3 = arith.constant 0 : index
    %c0_4 = arith.constant 0 : index
    %3 = vector.load %arg3[%c0_3, %c0_4] : memref<1x512xf32, #tpu.memory_space<vmem>>, vector<1x512xf32>
    %4 = vector.broadcast %3 : vector<1x512xf32> to vector<128x512xf32>
    %5 = arith.addf %2, %4 : vector<128x512xf32>
    %6 = arith.mulf %5, %5 : vector<128x512xf32>
    %c0_5 = arith.constant 0 : index
    %c0_6 = arith.constant 0 : index
    %7 = vector.load %arg4[%c0_5, %c0_6] : memref<512x64xf32, #tpu.memory_space<vmem>>, vector<512x64xf32>
    %cst_7 = arith.constant dense<0.000000e+00> : vector<128x64xf32>
    %8 = tpu.matmul %6, %7, %cst_7 {dimension_numbers = #tpu.dot_dimension_numbers<[1], [0], [0], [1], [0, 0, 1, 1], [], []>} : vector<128x512xf32>, vector<512x64xf32>, vector<128x64xf32> -> vector<128x64xf32>
    %c0_8 = arith.constant 0 : index
    %c0_9 = arith.constant 0 : index
    %9 = vector.load %arg5[%c0_8, %c0_9] : memref<1x64xf32, #tpu.memory_space<vmem>>, vector<1x64xf32>
    %cst_10 = arith.constant 5.000000e-01 : f32
    %10 = vector.broadcast %cst_10 : f32 to vector<128x64xf32>
    %11 = arith.mulf %10, %8 : vector<128x64xf32>
    %12 = vector.broadcast %9 : vector<1x64xf32> to vector<128x64xf32>
    %13 = arith.subf %12, %11 : vector<128x64xf32>
    %14 = tpu.iota {dimensions = array<i32: 0>} : vector<128x64xi32>
    %15 = tpu.iota {dimensions = array<i32: 1>} : vector<128x64xi32>
    %c128_i32 = arith.constant 128 : i32
    %16 = arith.muli %arg0, %c128_i32 : i32
    %17 = vector.broadcast %16 : i32 to vector<128x64xi32>
    %18 = arith.addi %17, %14 : vector<128x64xi32>
    %c16_i32 = arith.constant 16 : i32
    %19 = vector.broadcast %c16_i32 : i32 to vector<128x64xi32>
    %20 = arith.muli %18, %19 : vector<128x64xi32>
    %c4096_i32 = arith.constant 4096 : i32
    %21 = vector.broadcast %c4096_i32 : i32 to vector<128x64xi32>
    %22 = arith.subi %21, %20 : vector<128x64xi32>
    %c4_i32 = arith.constant 4 : i32
    %23 = vector.broadcast %c4_i32 : i32 to vector<128x64xi32>
    %24 = arith.muli %23, %22 : vector<128x64xi32>
    %25 = arith.cmpi slt, %15, %24 : vector<128x64xi32>
    %cst_11 = arith.constant 0xFF800000 : f32
    %26 = vector.broadcast %cst_11 : f32 to vector<128x64xf32>
    %27 = arith.select %25, %13, %26 : vector<128x64xi1>, vector<128x64xf32>
    %cst_12 = arith.constant dense<0xFF800000> : vector<128xf32>
    %28 = vector.multi_reduction <maximumf>, %27, %cst_12 [1] : vector<128x64xf32> to vector<128xf32>
    %29 = vector.shape_cast %28 : vector<128xf32> to vector<128x1xf32>
    %cst_13 = arith.constant dense<0xFF800000> : vector<1xf32>
    %30 = vector.multi_reduction <maximumf>, %29, %cst_13 [0] : vector<128x1xf32> to vector<1xf32>
    %31 = vector.shape_cast %30 : vector<1xf32> to vector<1x1xf32>
    %32 = vector.broadcast %31 : vector<1x1xf32> to vector<128x64xf32>
    %33 = arith.subf %27, %32 : vector<128x64xf32>
    %34 = math.exp %33 : vector<128x64xf32>
    %cst_14 = arith.constant dense<0.000000e+00> : vector<128xf32>
    %35 = vector.multi_reduction <add>, %34, %cst_14 [1] : vector<128x64xf32> to vector<128xf32>
    %36 = vector.shape_cast %35 : vector<128xf32> to vector<128x1xf32>
    %cst_15 = arith.constant dense<0.000000e+00> : vector<1xf32>
    %37 = vector.multi_reduction <add>, %36, %cst_15 [0] : vector<128x1xf32> to vector<1xf32>
    %38 = vector.shape_cast %37 : vector<1xf32> to vector<1x1xf32>
    %39 = math.log %38 : vector<1x1xf32>
    %40 = arith.addf %31, %39 : vector<1x1xf32>
    %41 = vector.shape_cast %40 : vector<1x1xf32> to vector<1x1x1xf32>
    %42 = vector.shape_cast %41 : vector<1x1x1xf32> to vector<1x1x1xf32>
    %43 = vector.broadcast %42 : vector<1x1x1xf32> to vector<1x1x128xf32>
    %c0_16 = arith.constant 0 : index
    %c0_17 = arith.constant 0 : index
    %c0_18 = arith.constant 0 : index
    %44 = vector.load %arg6[%c0_16, %c0_17, %c0_18] : memref<1x1x128xf32, #tpu.memory_space<vmem>>, vector<1x1x128xf32>
    tpu.vector_store %arg6[%c0_16, %c0_17, %c0_18], %43 {strides = array<i32>} : memref<1x1x128xf32, #tpu.memory_space<vmem>>, vector<1x1x128xf32>,
    return
  }
  func.func @transform_0(%arg0: i32) -> (i32, i32) {
    %c0_i32 = arith.constant 0 : i32
    %c0_i32_0 = arith.constant 0 : i32
    return %arg0, %c0_i32 : i32, i32
  }
  func.func @transform_1(%arg0: i32) -> (i32, i32) {
    %c0_i32 = arith.constant 0 : i32
    %c0_i32_0 = arith.constant 0 : i32
    %c0_i32_1 = arith.constant 0 : i32
    return %c0_i32, %c0_i32_0 : i32, i32
  }
  func.func @transform_2(%arg0: i32) -> (i32, i32) {
    %c0_i32 = arith.constant 0 : i32
    %c0_i32_0 = arith.constant 0 : i32
    %c0_i32_1 = arith.constant 0 : i32
    return %c0_i32, %c0_i32_0 : i32, i32
  }
  func.func @transform_3(%arg0: i32) -> (i32, i32) {
    %c0_i32 = arith.constant 0 : i32
    %c0_i32_0 = arith.constant 0 : i32
    %c0_i32_1 = arith.constant 0 : i32
    return %c0_i32, %c0_i32_0 : i32, i32
  }
  func.func @transform_4(%arg0: i32) -> (i32, i32) {
    %c0_i32 = arith.constant 0 : i32
    %c0_i32_0 = arith.constant 0 : i32
    %c0_i32_1 = arith.constant 0 : i32
    return %c0_i32, %c0_i32_0 : i32, i32
  }
  func.func @transform_5(%arg0: i32) -> (i32, i32, i32) {
    %c0_i32 = arith.constant 0 : i32
    %c0_i32_0 = arith.constant 0 : i32
    %c0_i32_1 = arith.constant 0 : i32
    return %arg0, %c0_i32, %c0_i32_0 : i32, i32, i32
  }
}

</mosaic_0001>

<bundles_post_ra>
// kernel: custom-call.4
= control target key start
LH: loop header
LB: loop body
LE: loop exit
PB: predicated region body
PF: predicated region fallthrough
CT: control target
= control target key end

     0   :  { %s469_s6 = smov 0   ;;  %s471_s7 = smov 0   ;;  %s549_s0 = inlined_call_operand.vmem [shape: f32[4,8,8], index: 0, kind: input, shape index: {}]   ;;  %s550_s1 = inlined_call_operand.vmem [shape: f32[4,8,8], index: 1, kind: output, shape index: {}]  }
   0x1   :  { %s473_s8 = smov 0  }
   0x2 LB: > { %s367_s9 = sadd.s32 4294967295, %s456_s8   ;;  %s26_s10 = sadd.s32 1, %s452_s7  ;;  %s456_s8 = sphi %s473_s8, %s7_s8   ;;  %s452_s7 = sphi %s471_s7, %s552_s7   ;;  %s448_s6 = sphi %s469_s6, %s551_s6  }
   0x3   : > { %p28_p0 = scmp.ge.s32.totalorder %s26_s10, 4  ;;  %p369_p1 = scmp.ge.s32.totalorder %s456_s8, 4 }
   0x4   : > { %s42_s11 = sand.u32 (!%p369_p1), 1, %s456_s8   ;;  %s371_s12 = sshll.u32 (!%p369_p1), %s452_s7, 3 }
   0x5   : > { %s554_s10 = smov (%p28_p0, %s26_s10), 0  ;;  %40 = sbr.rel (%p369_p1) target bundleno = 12 (0xc), region = 16 }
   0x6   : > { %s370_s13 = sshll.u32 (!%p369_p1), %s42_s11, 3  ;;  %s48_s16 = scalar_lea.vmem (!%p369_p1), %s549_s0, %s371_s12 }
   0x7   : > { %v76_v0 = vld [vmem:[%s48_s16] sm:$0xff] (!%p369_p1)  ;;  %s44_s17 = scalar_lea.vmem (!%p369_p1), [#allocation0], %s370_s13 }
   0x8   : > { %77 = vst [vmem:[%s44_s17] sm:$0xff] (!%p369_p1), %v76_v0 }
   0xc PF: > { %p372_p2 = scmp.ge.s32.totalorder %s456_s8, 1  ;;  %p82_p3 = scmp.lt.s32.totalorder %s456_s8, 5 }
   0xe   : > { %p83_p4 = pnand %p372_p2, %p82_p3 }
   0xf   : > { %s89_s18 = sand.u32 (!%p83_p4), 1, %s367_s9   ;;  %v458_v1 = vmov (!%p83_p4), 0.0   ;;  %vm101_vm0 = vcmask (!%p83_p4), 7168   ;;  %vm119_vm1 = vcmask (!%p83_p4), 15368   ;;  %vm136_vm2 = vcmask (!%p83_p4), 1047553   ;;  %s390_s22 = sshll.u32 (!%p83_p4), %s448_s6, 3 }
  0x10   : > { %86 = sbr.rel (%p83_p4) target bundleno = 1377 (0x561), region = 54  ;;  %s373_s19 = sshll.u32 (!%p83_p4), %s89_s18, 3  ;;  %vm137_vm3 = vmand (!%p83_p4), %vm119_vm1, %vm136_vm2  ;;  %vm141_vm4 = vcmask (!%p83_p4), 23568   ;;  %vm158_vm5 = vcmask (!%p83_p4), 1047554   ;;  %vm163_vm7 = vcmask (!%p83_p4), 31768   ;;  %vm180_vm8 = vcmask (!%p83_p4), 1047555  }
  0x11   : > { %s496_s20 = scalar_lea.vmem (!%p83_p4), [#allocation1], %s373_s19  ;;  %s500_s21 = scalar_lea.vmem (!%p83_p4), [#allocation0], %s373_s19  ;;  %vm159_vm6 = vmand (!%p83_p4), %vm141_vm4, %vm158_vm5  ;;  %vm185_vm10 = vcmask (!%p83_p4), 39968   ;;  %vm202_vm11 = vcmask (!%p83_p4), 1047556   ;;  %vm207_vm13 = vcmask (!%p83_p4), 48168   ;;  %vm224_vm14 = vcmask (!%p83_p4), 1047557  }
  0x12   : > { %100 = vst [vmem:[%s496_s20] sm:$0xff] (!%p83_p4), %v458_v1  ;;  %v103_v5 = vld [vmem:[%s500_s21] ss:$0 sm:$0xff] (!%p83_p4)  ;;  %v376_v17 = vld [vmem:[%s500_s21 + $0x1] ss:$0 sm:$0xff] (!%p83_p4)  ;;  %v378_v29 = vld [vmem:[%s500_s21 + $0x2] ss:$0 sm:$0xff] (!%p83_p4)  ;;  %s280_s25 = scalar_lea.vmem (!%p83_p4), %s550_s1, %s390_s22 }
  0x13   : > { %v504_v9 = vld [vmem:[%s500_s21] sm:$0xff] (!%p83_p4)  ;;  %vm181_vm9 = vmand (!%p83_p4), %vm163_vm7, %vm180_vm8  ;;  %vm246_vm1 = vcmask (!%p83_p4), 1047558   ;;  %vm268_vm4 = vcmask (!%p83_p4), 1047559  }
  0x14   : > { %v380_v41 = vld [vmem:[%s500_s21 + $0x3] ss:$0 sm:$0xff] (!%p83_p4)  ;;  %v382_v53 = vld [vmem:[%s500_s21 + $0x4] ss:$0 sm:$0xff] (!%p83_p4)  ;;  %vm203_vm12 = vmand (!%p83_p4), %vm185_vm10, %vm202_vm11 }
  0x15   : > { %v384_v1 = vld [vmem:[%s500_s21 + $0x5] ss:$0 sm:$0xff] (!%p83_p4)  ;;  %vm225_vm15 = vmand (!%p83_p4), %vm207_vm13, %vm224_vm14 }
  0x19   : > { %v102_v2 = vld [vmem:[%s496_s20] ss:$0 sm:$0xff] }
  0x1a   : > { %v104_v3 = vmul.f32 %v102_v2, %v102_v2  ;;  %v111_v4 = vmul.f32 0.0, %v102_v2 }
  0x1c   : > { %105 = vadd.xlane.f32.xlu0 %v104_v3 }
  0x20   : > { %112 = vadd.xlane.f32.xlu0 %v111_v4 }
  0xa9   : > { %v106_v6 = vpop.xlane.xlu0 %105 }
  0xaa   : > { %v107_v7 = vsub.f32 %v103_v5, %v106_v6 }
  0xac   : > { %418 = vrsqrt.f32 %v107_v7 }
  0xad   : > { %v113_v8 = vpop.xlane.xlu0 %112 }
  0xae   : > { %v114_v10 = vsub.f32 %v504_v9, %v113_v8 }
  0xb6   : > { %v419_v11 = vpop.eup %418 }
  0xb7   : > { %v115_v12 = vmul.f32 %v419_v11, %v114_v10 }
  0xb9   : > { %v116_v13 = vsel %vm101_vm0, %v115_v12, 0.0  ;;  %vm229_vm0 = vcmask 56368  }
  0xba   : > { %118 = vst [vmem:[%s496_s20] sm:$0xff] %v116_v13  ;;  %vm247_vm2 = vmand %vm229_vm0, %vm246_vm1 }
  0xc1   : > { %v375_v14 = vld [vmem:[%s496_s20 + $0x1] ss:$0 sm:$0xff] }
  0xc2   : > { %v124_v15 = vmul.f32 %v375_v14, %v375_v14  ;;  %v131_v16 = vmul.f32 %v375_v14, %v116_v13  ;;  %v386_v14 = vld [vmem:[%s500_s21 + $0x6] ss:$0 sm:$0xff] }
  0xc4   : > { %125 = vadd.xlane.f32.xlu1 %v124_v15 }
  0xc8   : > { %132 = vadd.xlane.f32.xlu1 %v131_v16 }
 0x151   : > { %v126_v18 = vpop.xlane.xlu1 %125 }
 0x152   : > { %v127_v19 = vsub.f32 %v376_v17, %v126_v18 }
 0x154   : > { %420 = vrsqrt.f32 %v127_v19 }
 0x155   : > { %v133_v20 = vpop.xlane.xlu1 %132 }
 0x156   : > { %v134_v21 = vsub.f32 %v504_v9, %v133_v20 }
 0x15e   : > { %v421_v22 = vpop.eup %420 }
 0x15f   : > { %v135_v23 = vmul.f32 %v421_v22, %v134_v21 }
 0x161   : > { %v138_v24 = vsel %vm137_vm3, %v135_v23, 0.0  ;;  %vm251_vm3 = vcmask 64568  }
 0x162   : > { %v139_v25 = vadd.f32 %v138_v24, %v116_v13  ;;  %vm269_vm5 = vmand %vm251_vm3, %vm268_vm4 }
 0x164   : > { %140 = vst [vmem:[%s496_s20] sm:$0xff] %v139_v25 }
 0x16b   : > { %v377_v26 = vld [vmem:[%s496_s20 + $0x2] ss:$0 sm:$0xff] }
 0x16c   : > { %v153_v27 = vmul.f32 %v377_v26, %v139_v25  ;;  %v146_v28 = vmul.f32 %v377_v26, %v377_v26  ;;  %v388_v26 = vld [vmem:[%s500_s21 + $0x7] ss:$0 sm:$0xff] }
 0x16e   : > { %154 = vadd.xlane.f32.xlu1 %v153_v27  ;;  %147 = vadd.xlane.f32.xlu0 %v146_v28 }
 0x1fb   : > { %v148_v30 = vpop.xlane.xlu0 %147  ;;  %v155_v32 = vpop.xlane.xlu1 %154 }
 0x1fc   : > { %v149_v31 = vsub.f32 %v378_v29, %v148_v30  ;;  %v156_v33 = vsub.f32 %v504_v9, %v155_v32 }
 0x1fe   : > { %422 = vrsqrt.f32 %v149_v31 }
 0x208   : > { %v423_v34 = vpop.eup %422 }
 0x209   : > { %v157_v35 = vmul.f32 %v423_v34, %v156_v33 }
 0x20b   : > { %v160_v36 = vsel %vm159_vm6, %v157_v35, 0.0 }
 0x20c   : > { %v161_v37 = vadd.f32 %v160_v36, %v139_v25 }
 0x20e   : > { %162 = vst [vmem:[%s496_s20] sm:$0xff] %v161_v37 }
 0x215   : > { %v379_v38 = vld [vmem:[%s496_s20 + $0x3] ss:$0 sm:$0xff] }
 0x216   : > { %v175_v39 = vmul.f32 %v379_v38, %v161_v37  ;;  %v168_v40 = vmul.f32 %v379_v38, %v379_v38 }
 0x218   : > { %176 = vadd.xlane.f32.xlu1 %v175_v39  ;;  %169 = vadd.xlane.f32.xlu0 %v168_v40 }
 0x2a5   : > { %v170_v42 = vpop.xlane.xlu0 %169  ;;  %v177_v44 = vpop.xlane.xlu1 %176 }
 0x2a6   : > { %v171_v43 = vsub.f32 %v380_v41, %v170_v42  ;;  %v178_v45 = vsub.f32 %v504_v9, %v177_v44 }
 0x2a8   : > { %424 = vrsqrt.f32 %v171_v43 }
 0x2b2   : > { %v425_v46 = vpop.eup %424 }
 0x2b3   : > { %v179_v47 = vmul.f32 %v425_v46, %v178_v45 }
 0x2b5   : > { %v182_v48 = vsel %vm181_vm9, %v179_v47, 0.0 }
 0x2b6   : > { %v183_v49 = vadd.f32 %v182_v48, %v161_v37 }
 0x2b8   : > { %184 = vst [vmem:[%s496_s20] sm:$0xff] %v183_v49 }
 0x2bf   : > { %v381_v50 = vld [vmem:[%s496_s20 + $0x4] ss:$0 sm:$0xff] }
 0x2c0   : > { %v197_v51 = vmul.f32 %v381_v50, %v183_v49  ;;  %v190_v52 = vmul.f32 %v381_v50, %v381_v50 }
 0x2c2   : > { %198 = vadd.xlane.f32.xlu1 %v197_v51  ;;  %191 = vadd.xlane.f32.xlu0 %v190_v52 }
 0x34f   : > { %v192_v54 = vpop.xlane.xlu0 %191  ;;  %v199_v56 = vpop.xlane.xlu1 %198 }
 0x350   : > { %v193_v55 = vsub.f32 %v382_v53, %v192_v54  ;;  %v200_v57 = vsub.f32 %v504_v9, %v199_v56 }
 0x352   : > { %426 = vrsqrt.f32 %v193_v55 }
 0x35c   : > { %v427_v58 = vpop.eup %426 }
 0x35d   : > { %v201_v59 = vmul.f32 %v427_v58, %v200_v57 }
 0x35f   : > { %v204_v60 = vsel %vm203_vm12, %v201_v59, 0.0 }
 0x360   : > { %v205_v61 = vadd.f32 %v204_v60, %v183_v49 }
 0x362   : > { %206 = vst [vmem:[%s496_s20] sm:$0xff] %v205_v61 }
 0x369   : > { %v383_v62 = vld [vmem:[%s496_s20 + $0x5] ss:$0 sm:$0xff] }
 0x36a   : > { %v219_v63 = vmul.f32 %v383_v62, %v205_v61  ;;  %v212_v0 = vmul.f32 %v383_v62, %v383_v62 }
 0x36c   : > { %220 = vadd.xlane.f32.xlu1 %v219_v63  ;;  %213 = vadd.xlane.f32.xlu0 %v212_v0 }
 0x3f9   : > { %v214_v2 = vpop.xlane.xlu0 %213  ;;  %v221_v4 = vpop.xlane.xlu1 %220 }
 0x3fa   : > { %v215_v3 = vsub.f32 %v384_v1, %v214_v2  ;;  %v222_v5 = vsub.f32 %v504_v9, %v221_v4 }
 0x3fc   : > { %428 = vrsqrt.f32 %v215_v3 }
 0x406   : > { %v429_v6 = vpop.eup %428 }
 0x407   : > { %v223_v7 = vmul.f32 %v429_v6, %v222_v5 }
 0x409   : > { %v226_v8 = vsel %vm225_vm15, %v223_v7, 0.0 }
 0x40a   : > { %v227_v10 = vadd.f32 %v226_v8, %v205_v61 }
 0x40c   : > { %228 = vst [vmem:[%s496_s20] sm:$0xff] %v227_v10 }
 0x413   : > { %v385_v11 = vld [vmem:[%s496_s20 + $0x6] ss:$0 sm:$0xff] }
 0x414   : > { %v241_v12 = vmul.f32 %v385_v11, %v227_v10  ;;  %v234_v13 = vmul.f32 %v385_v11, %v385_v11 }
 0x416   : > { %242 = vadd.xlane.f32.xlu1 %v241_v12  ;;  %235 = vadd.xlane.f32.xlu0 %v234_v13 }
 0x4a3   : > { %v236_v15 = vpop.xlane.xlu0 %235  ;;  %v243_v17 = vpop.xlane.xlu1 %242 }
 0x4a4   : > { %v237_v16 = vsub.f32 %v386_v14, %v236_v15  ;;  %v244_v18 = vsub.f32 %v504_v9, %v243_v17 }
 0x4a6   : > { %430 = vrsqrt.f32 %v237_v16 }
 0x4b0   : > { %v431_v19 = vpop.eup %430 }
 0x4b1   : > { %v245_v20 = vmul.f32 %v431_v19, %v244_v18 }
 0x4b3   : > { %v248_v21 = vsel %vm247_vm2, %v245_v20, 0.0 }
 0x4b4   : > { %v249_v22 = vadd.f32 %v248_v21, %v227_v10 }
 0x4b6   : > { %250 = vst [vmem:[%s496_s20] sm:$0xff] %v249_v22 }
 0x4bd   : > { %v387_v23 = vld [vmem:[%s496_s20 + $0x7] ss:$0 sm:$0xff] }
 0x4be   : > { %v263_v24 = vmul.f32 %v387_v23, %v249_v22  ;;  %v256_v25 = vmul.f32 %v387_v23, %v387_v23 }
 0x4c0   : > { %264 = vadd.xlane.f32.xlu1 %v263_v24  ;;  %257 = vadd.xlane.f32.xlu0 %v256_v25 }
 0x54d   : > { %v258_v27 = vpop.xlane.xlu0 %257  ;;  %v265_v29 = vpop.xlane.xlu1 %264 }
 0x54e   : > { %v259_v28 = vsub.f32 %v388_v26, %v258_v27  ;;  %v266_v30 = vsub.f32 %v504_v9, %v265_v29 }
 0x550   : > { %432 = vrsqrt.f32 %v259_v28 }
 0x55a   : > { %v433_v31 = vpop.eup %432 }
 0x55b   : > { %v267_v32 = vmul.f32 %v433_v31, %v266_v30 }
 0x55d   : > { %v270_v33 = vsel %vm269_vm5, %v267_v32, 0.0 }
 0x55e   : > { %v271_v34 = vadd.f32 %v270_v33, %v249_v22 }
 0x560   : > { %272 = vst [vmem:[%s496_s20] sm:$0xff] %v271_v34  ;;  %309 = vst [vmem:[%s280_s25] sm:$0xff] %v271_v34 }
 0x561 PF: > { %s7_s8 = sadd.s32 1, %s456_s8   ;;  %s551_s6 = smov %s452_s7 }
 0x562   : > { %p4_p5 = scmp.ge.s32.totalorder %s7_s8, 6   ;;  %s552_s7 = smov %s554_s10 }
 0x564   :  { %6 = sbr.rel (!%p4_p5) target bundleno = 2 (0x2), region = 132 }

// kernel: custom-call.5
= control target key start
LH: loop header
LB: loop body
LE: loop exit
PB: predicated region body
PF: predicated region fallthrough
CT: control target
= control target key end

     0   :  { %s385_s6 = smov 0   ;;  %s387_s7 = smov 0   ;;  %s443_s0 = inlined_call_operand.vmem [shape: f32[4,1,8,8], index: 0, kind: input, shape index: {}]   ;;  %s444_s1 = inlined_call_operand.vmem [shape: f32[4,1,8,8], index: 1, kind: output, shape index: {}]  }
   0x1   :  { %s389_s8 = smov 0  }
   0x2 LB: > { %s311_s9 = sadd.s32 4294967295, %s372_s8   ;;  %s33_s10 = sadd.s32 1, %s368_s7  ;;  %s372_s8 = sphi %s389_s8, %s7_s8   ;;  %s368_s7 = sphi %s387_s7, %s446_s7   ;;  %s364_s6 = sphi %s385_s6, %s445_s6  }
   0x3   : > { %p35_p0 = scmp.ge.s32.totalorder %s33_s10, 4  ;;  %p313_p1 = scmp.ge.s32.totalorder %s372_s8, 4 }
   0x4   : > { %s49_s11 = sand.u32 (!%p313_p1), 1, %s372_s8   ;;  %s315_s12 = sshll.u32 (!%p313_p1), %s368_s7, 3 }
   0x5   : > { %s448_s10 = smov (%p35_p0, %s33_s10), 0  ;;  %47 = sbr.rel (%p313_p1) target bundleno = 12 (0xc), region = 16 }
   0x6   : > { %s314_s13 = sshll.u32 (!%p313_p1), %s49_s11, 3  ;;  %s56_s16 = scalar_lea.vmem (!%p313_p1), %s443_s0, %s315_s12 }
   0x7   : > { %v84_v0 = vld [vmem:[%s56_s16] sm:$0xff] (!%p313_p1)  ;;  %s51_s17 = scalar_lea.vmem (!%p313_p1), [#allocation0], %s314_s13 }
   0x8   : > { %85 = vst [vmem:[%s51_s17] sm:$0xff] (!%p313_p1), %v84_v0 }
   0xc PF: > { %p316_p2 = scmp.ge.s32.totalorder %s372_s8, 1  ;;  %p90_p3 = scmp.lt.s32.totalorder %s372_s8, 5 }
   0xe   : > { %p91_p4 = pnand %p316_p2, %p90_p3 }
  0x10   : > { %94 = sbr.rel (%p91_p4) target bundleno = 1213 (0x4bd), region = 54 }
  0x17   : > { %s97_s18 = sand.u32 1, %s311_s9   ;;  %v108_v1 = vlaneseq  ;;  %v374_v10 = vmov -1.0   ;;  %s320_s21 = sshll.u32 %s364_s6, 3 }
  0x18   : > { %s317_s19 = sshll.u32 %s97_s18, 3  ;;  %s219_s24 = scalar_lea.vmem %s444_s1, %s320_s21 }
  0x19   : > { %v412_v2 = vand.u32 127, %v108_v1  ;;  %v112_v3 = vshrl.u32 %v108_v1, 7  ;;  %s99_s20 = scalar_lea.vmem [#allocation0], %s317_s19 }
  0x1a   : > { %v115_v4 = vld [vmem:[%s99_s20] sm:$0xff] }
  0x1b   : > { %vm110_vm0 = vcmp.lt.s32.totalorder %v412_v2, 8  ;;  %vm114_vm1 = vcmp.eq.s32.totalorder %v112_v3, %v412_v2  ;;  %vm119_vm2 = vcmp.ge.s32.totalorder %v112_v3, %v412_v2  ;;  %vm133_vm4 = vcmp.eq.s32.totalorder %v412_v2, 0 }
  0x1c   : > { %v116_v5 = vsel %vm114_vm1, %v115_v4, 0.0  ;;  %vm120_vm3 = vmand %vm119_vm2, %vm110_vm0  ;;  %vm130_vm5 = vcmp.eq.s32.totalorder %v412_v2, %v112_v3  ;;  %v134_v11 = vsel %vm133_vm4, 1.0, %v374_v10  ;;  %vm141_vm6 = vcmp.eq.s32.totalorder %v412_v2, 1 }
  0x1d   : > { %v121_v6 = vsel %vm120_vm3, %v115_v4, 0.0  ;;  %117 = vadd.xlane.f32.xlu0 %v116_v5  ;;  %v135_v12 = vsel %vm130_vm5, %v134_v11, 0.0  ;;  %vm151_vm7 = vcmp.eq.s32.totalorder %v412_v2, 2  ;;  %vm161_vm8 = vcmp.eq.s32.totalorder %v412_v2, 3 }
  0x1e   : > { %vm171_vm9 = vcmp.eq.s32.totalorder %v412_v2, 4  ;;  %vm181_vm10 = vcmp.eq.s32.totalorder %v412_v2, 5  ;;  %vm191_vm11 = vcmp.eq.s32.totalorder %v412_v2, 6  ;;  %vm201_vm12 = vcmp.eq.s32.totalorder %v412_v2, 7 }
  0xaa   : > { %v417_v7 = vpop.xlane.xlu0 %117 }
  0xab   : > { %348 = vrcp.f32 %v417_v7  ;;  %vm208_vm13 = vweird.f32 %v417_v7 }
  0xb5   : > { %v349_v8 = vpop.eup %348 }
  0xb6   : > { %v123_v9 = vmul.f32 %v349_v8, %v121_v6 }
  0xb8   : > { %124 = vst [vmem:[#allocation2] sm:$0xff] %v123_v9 }
  0xbf   : > { %v137_v13 = vld [vmem:[#allocation2 + $0x1] ss:$0 sm:$0xff]  ;;  %v147_v16 = vld [vmem:[#allocation2 + $0x2] ss:$0 sm:$0xff]  ;;  %v157_v21 = vld [vmem:[#allocation2 + $0x3] ss:$0 sm:$0xff] }
  0xc0   : > { %v138_v14 = vxor.u32 2147483648, %v137_v13  ;;  %v148_v18 = vxor.u32 2147483648, %v147_v16  ;;  %v158_v23 = vxor.u32 2147483648, %v157_v21  ;;  %v167_v26 = vld [vmem:[#allocation2 + $0x4] ss:$0 sm:$0xff] }
  0xc1   : > { %v168_v28 = vxor.u32 2147483648, %v167_v26  ;;  %v177_v31 = vld [vmem:[#allocation2 + $0x5] ss:$0 sm:$0xff]  ;;  %v187_v36 = vld [vmem:[#allocation2 + $0x6] ss:$0 sm:$0xff] }
  0xc2   : > { %v142_v15 = vmul.f32 %v138_v14, %v135_v12  ;;  %v178_v33 = vxor.u32 2147483648, %v177_v31  ;;  %v188_v38 = vxor.u32 2147483648, %v187_v36  ;;  %v197_v41 = vld [vmem:[#allocation2 + $0x7] ss:$0 sm:$0xff] }
  0xc3   : > { %v198_v43 = vxor.u32 2147483648, %v197_v41 }
  0xc4   : > { %143 = vadd.xlane.f32.xlu0 %v142_v15 }
 0x151   : > { %v144_v17 = vpop.xlane.xlu0 %143 }
 0x152   : > { %v145_v19 = vsel %vm141_vm6, %v144_v17, %v135_v12 }
 0x153   : > { %v152_v20 = vmul.f32 %v148_v18, %v145_v19 }
 0x155   : > { %153 = vadd.xlane.f32.xlu1 %v152_v20 }
 0x1e2   : > { %v154_v22 = vpop.xlane.xlu1 %153 }
 0x1e3   : > { %v155_v24 = vsel %vm151_vm7, %v154_v22, %v145_v19 }
 0x1e4   : > { %v162_v25 = vmul.f32 %v158_v23, %v155_v24 }
 0x1e6   : > { %163 = vadd.xlane.f32.xlu1 %v162_v25 }
 0x273   : > { %v164_v27 = vpop.xlane.xlu1 %163 }
 0x274   : > { %v165_v29 = vsel %vm161_vm8, %v164_v27, %v155_v24 }
 0x275   : > { %v172_v30 = vmul.f32 %v168_v28, %v165_v29 }
 0x277   : > { %173 = vadd.xlane.f32.xlu0 %v172_v30 }
 0x304   : > { %v174_v32 = vpop.xlane.xlu0 %173 }
 0x305   : > { %v175_v34 = vsel %vm171_vm9, %v174_v32, %v165_v29 }
 0x306   : > { %v182_v35 = vmul.f32 %v178_v33, %v175_v34 }
 0x308   : > { %183 = vadd.xlane.f32.xlu1 %v182_v35 }
 0x395   : > { %v184_v37 = vpop.xlane.xlu1 %183 }
 0x396   : > { %v185_v39 = vsel %vm181_vm10, %v184_v37, %v175_v34 }
 0x397   : > { %v192_v40 = vmul.f32 %v188_v38, %v185_v39 }
 0x399   : > { %193 = vadd.xlane.f32.xlu0 %v192_v40 }
 0x426   : > { %v194_v42 = vpop.xlane.xlu0 %193 }
 0x427   : > { %v195_v44 = vsel %vm191_vm11, %v194_v42, %v185_v39 }
 0x428   : > { %v202_v45 = vmul.f32 %v198_v43, %v195_v44 }
 0x42a   : > { %203 = vadd.xlane.f32.xlu1 %v202_v45 }
 0x4b7   : > { %v204_v46 = vpop.xlane.xlu1 %203 }
 0x4b8   : > { %v205_v47 = vsel %vm201_vm12, %v204_v46, %v195_v44 }
 0x4b9   : > { %v207_v48 = vmul.f32 %v349_v8, %v205_v47 }
 0x4bb   : > { %v209_v49 = vsel %vm208_vm13, %v205_v47, %v207_v48 }
 0x4bc   : > { %248 = vst [vmem:[%s219_s24] sm:$0xff] %v209_v49 }
 0x4bd PF: > { %s7_s8 = sadd.s32 1, %s372_s8   ;;  %s445_s6 = smov %s368_s7 }
 0x4be   : > { %p4_p5 = scmp.ge.s32.totalorder %s7_s8, 6   ;;  %s446_s7 = smov %s448_s10 }
 0x4c0   :  { %6 = sbr.rel (!%p4_p5) target bundleno = 2 (0x2), region = 125 }

// kernel: neg.6
= control target key start
LH: loop header
LB: loop body
LE: loop exit
PB: predicated region body
PF: predicated region fallthrough
CT: control target
= control target key end

     0   :  { %s24_s0 = inlined_call_operand.vmem [shape: f32[4,8], index: 0, kind: input, shape index: {}]   ;;  %s25_s1 = inlined_call_operand.vmem [shape: f32[4,8], index: 1, kind: output, shape index: {}]  }
   0x1   :  { %v2_v0 = vld [vmem:[%s24_s0] sm:$0xf] }
   0x2   :  { %v5_v1 = vxor.u32 2147483648, %v2_v0 }
   0x4   :  { %7 = vst [vmem:[%s25_s1] sm:$0xf] %v5_v1 }

// kernel: tile.11
= control target key start
LH: loop header
LB: loop body
LE: loop exit
PB: predicated region body
PF: predicated region fallthrough
CT: control target
= control target key end

     0   :  { %s28_s0 = inlined_call_operand.vmem [shape: f32[32], index: 0, kind: input, shape index: {}]   ;;  %s29_s1 = inlined_call_operand.vmem [shape: f32[16,32], index: 1, kind: output, shape index: {}]  }
   0x1   :  { %v4_v0 = vld [vmem:[%s28_s0] ss:$0 sm:$0xff] }
   0x2   :  { %5 = vst [vmem:[%s29_s1] sm:$0xff] %v4_v0  ;;  %8 = vst [vmem:[%s29_s1 + $0x8] sm:$0xff] %v4_v0 }

// kernel: tile.12
= control target key start
LH: loop header
LB: loop body
LE: loop exit
PB: predicated region body
PF: predicated region fallthrough
CT: control target
= control target key end

     0   :  { %s57_s8 = smov 96   ;;  %vm3_vm0 = vcmask 261120   ;;  %s59_s15 = smov 64   ;;  %vm9_vm1 = vcmask 1048320   ;;  %vm15_vm2 = vcmask 785920   ;;  %vm21_vm3 = vcmask 523520   ;;  %s94_s0 = inlined_call_operand.vmem [shape: f32[16,32], index: 0, kind: input, shape index: {}]   ;;  %s95_s1 = inlined_call_operand.vmem [shape: f32[1,512], index: 1, kind: output, shape index: {}]  }
   0x1   :  { %v48_v0 = vld [vmem:[%s94_s0 + $0x3] ss:$4 sm:$0xf]   ;;  %v49_v1 = vld [vmem:[%s94_s0 + $0x2] ss:$4 sm:$0xf]  }
   0x2   :  { %7 = vrot.lane.b32.xlu0 %v48_v0, %s57_s8  ;;  %v50_v2 = vld [vmem:[%s94_s0 + $0x1] ss:$4 sm:$0xf]   ;;  %v2_v3 = vld [vmem:[%s94_s0] ss:$4 sm:$0xf]  }
   0x3   :  { %s58_s0 = smov 32   ;;  %4 = vst.msk [vmem:[#allocation0] ss:$8 sm:$0xf] %vm3_vm0, %v2_v3  }
   0x4   :  { %19 = vrot.lane.b32.xlu1 %v50_v2, %s58_s0 }
   0x6   :  { %13 = vrot.lane.b32.xlu0 %v49_v1, %s59_s15 }
  0x74   :  { %v8_v4 = vpop.permute.xlu0 %7  }
  0x75   :  { %10 = vst.msk [vmem:[#allocation0] ss:$8 sm:$0xf] %vm9_vm1, %v8_v4  }
  0x76   :  { %v20_v5 = vpop.permute.xlu1 %19  }
  0x78   :  { %v14_v6 = vpop.permute.xlu0 %13  }
  0x79   :  { %16 = vst.msk [vmem:[#allocation0] ss:$8 sm:$0xf] %vm15_vm2, %v14_v6  }
  0x7a   :  { %22 = vst.msk [vmem:[#allocation0] ss:$8 sm:$0xf] %vm21_vm3, %v20_v5  }
  0x81   :  { %v26_v7 = vld [vmem:[#allocation0] sm:$0x1]  ;;  %v30_v8 = vld [vmem:[#allocation0 + $0x8] sm:$0x1]  ;;  %v35_v9 = vld [vmem:[#allocation0 + $0x10] sm:$0x1] }
  0x82   :  { %28 = vst [vmem:[%s95_s1] sm:$0x1] %v26_v7  ;;  %51 = vst [vmem:[%s95_s1 + $0x1] sm:$0x1] %v30_v8  ;;  %v41_v10 = vld [vmem:[#allocation0 + $0x18] sm:$0x1] }
  0x83   :  { %52 = vst [vmem:[%s95_s1 + $0x2] sm:$0x1] %v35_v9  ;;  %53 = vst [vmem:[%s95_s1 + $0x3] sm:$0x1] %v41_v10 }

// kernel: tile.16
= control target key start
LH: loop header
LB: loop body
LE: loop exit
PB: predicated region body
PF: predicated region fallthrough
CT: control target
= control target key end

     0   :  { %s28_s0 = inlined_call_operand.vmem [shape: f32[4], index: 0, kind: input, shape index: {}]   ;;  %s29_s1 = inlined_call_operand.vmem [shape: f32[16,4], index: 1, kind: output, shape index: {}]  }
   0x1   :  { %v4_v0 = vld [vmem:[%s28_s0] ss:$0 sm:$0xff] }
   0x2   :  { %5 = vst [vmem:[%s29_s1] sm:$0xff] %v4_v0  ;;  %8 = vst [vmem:[%s29_s1 + $0x8] sm:$0xff] %v4_v0 }

// kernel: tile.17
= control target key start
LH: loop header
LB: loop body
LE: loop exit
PB: predicated region body
PF: predicated region fallthrough
CT: control target
= control target key end

     0   :  { %s131_s10 = smov 60   ;;  %s132_s11 = smov 52   ;;  %vm3_vm0 = vcmask 31744   ;;  %vm9_vm1 = vcmask 523744   ;;  %vm15_vm2 = vcmask 490944   ;;  %vm21_vm3 = vcmask 458144   ;;  %s207_s0 = inlined_call_operand.vmem [shape: f32[16,4], index: 0, kind: input, shape index: {}]   ;;  %s208_s1 = inlined_call_operand.vmem [shape: f32[1,64], index: 1, kind: output, shape index: {}]  }
   0x1   :  { %v101_v0 = vld [vmem:[%s207_s0 + $0xf] sm:$0x1]   ;;  %v103_v1 = vld [vmem:[%s207_s0 + $0xd] sm:$0x1]   ;;  %v102_v2 = vld [vmem:[%s207_s0 + $0xe] sm:$0x1]  }
   0x2   :  { %7 = vrot.lane.b32.xlu0 %v101_v0, %s131_s10  ;;  %19 = vrot.lane.b32.xlu1 %v103_v1, %s132_s11  ;;  %v104_v3 = vld [vmem:[%s207_s0 + $0xc] sm:$0x1]   ;;  %s133_s16 = smov 56   ;;  %s134_s17 = smov 48   ;;  %v105_v4 = vld [vmem:[%s207_s0 + $0xb] sm:$0x1]  }
   0x3   :  { %v106_v5 = vld [vmem:[%s207_s0 + $0xa] sm:$0x1]   ;;  %v2_v6 = vld [vmem:[%s207_s0] sm:$0x1]   ;;  %s135_s24 = smov 44   ;;  %s136_s25 = smov 40  }
   0x4   :  { %4 = vst.msk [vmem:[#allocation0] sm:$0x1] %vm3_vm0, %v2_v6   ;;  %v107_v7 = vld [vmem:[%s207_s0 + $0x9] sm:$0x1]   ;;  %v108_v8 = vld [vmem:[%s207_s0 + $0x8] sm:$0x1]  }
   0x5   :  { %s137_s30 = smov 36   ;;  %s138_s2 = smov 32   ;;  %v109_v9 = vld [vmem:[%s207_s0 + $0x7] sm:$0x1]   ;;  %v110_v10 = vld [vmem:[%s207_s0 + $0x6] sm:$0x1]  }
   0x6   :  { %13 = vrot.lane.b32.xlu0 %v102_v2, %s133_s16  ;;  %25 = vrot.lane.b32.xlu1 %v104_v3, %s134_s17  ;;  %s139_s7 = smov 28   ;;  %s140_s8 = smov 24   ;;  %v111_v11 = vld [vmem:[%s207_s0 + $0x5] sm:$0x1]   ;;  %v112_v12 = vld [vmem:[%s207_s0 + $0x4] sm:$0x1]  }
   0x7   :  { %s141_s13 = smov 20   ;;  %s142_s14 = smov 16   ;;  %v113_v13 = vld [vmem:[%s207_s0 + $0x3] sm:$0x1]   ;;  %v114_v14 = vld [vmem:[%s207_s0 + $0x2] sm:$0x1]  }
   0x8   :  { %s143_s19 = smov 12   ;;  %s144_s20 = smov 8   ;;  %v115_v15 = vld [vmem:[%s207_s0 + $0x1] sm:$0x1]   ;;  %vm27_vm4 = vcmask 425344   ;;  %vm33_vm5 = vcmask 392544  }
   0x9   :  { %s145_s0 = smov 4   ;;  %vm39_vm6 = vcmask 359744   ;;  %vm45_vm7 = vcmask 326944   ;;  %vm51_vm8 = vcmask 294144   ;;  %vm57_vm9 = vcmask 261344  }
   0xa   :  { %31 = vrot.lane.b32.xlu0 %v105_v4, %s135_s24  ;;  %37 = vrot.lane.b32.xlu1 %v106_v5, %s136_s25  ;;  %vm63_vm10 = vcmask 228544   ;;  %vm69_vm11 = vcmask 195744   ;;  %vm75_vm12 = vcmask 162944   ;;  %vm81_vm13 = vcmask 130144  }
   0xb   :  { %vm87_vm14 = vcmask 97344   ;;  %vm93_vm15 = vcmask 64544  }
   0xe   :  { %43 = vrot.lane.b32.xlu0 %v107_v7, %s137_s30  ;;  %49 = vrot.lane.b32.xlu1 %v108_v8, %s138_s2 }
  0x12   :  { %55 = vrot.lane.b32.xlu0 %v109_v9, %s139_s7  ;;  %61 = vrot.lane.b32.xlu1 %v110_v10, %s140_s8 }
  0x16   :  { %67 = vrot.lane.b32.xlu0 %v111_v11, %s141_s13  ;;  %73 = vrot.lane.b32.xlu1 %v112_v12, %s142_s14 }
  0x1a   :  { %79 = vrot.lane.b32.xlu0 %v113_v13, %s143_s19  ;;  %85 = vrot.lane.b32.xlu1 %v114_v14, %s144_s20 }
  0x1e   :  { %91 = vrot.lane.b32.xlu0 %v115_v15, %s145_s0 }
  0x74   :  { %v8_v16 = vpop.permute.xlu0 %7   ;;  %v20_v17 = vpop.permute.xlu1 %19  }
  0x75   :  { %10 = vst.msk [vmem:[#allocation0] sm:$0x1] %vm9_vm1, %v8_v16  }
  0x78   :  { %v14_v18 = vpop.permute.xlu0 %13   ;;  %v26_v19 = vpop.permute.xlu1 %25  }
  0x79   :  { %16 = vst.msk [vmem:[#allocation0] sm:$0x1] %vm15_vm2, %v14_v18  }
  0x7a   :  { %22 = vst.msk [vmem:[#allocation0] sm:$0x1] %vm21_vm3, %v20_v17  }
  0x7b   :  { %28 = vst.msk [vmem:[#allocation0] sm:$0x1] %vm27_vm4, %v26_v19  }
  0x7c   :  { %v32_v20 = vpop.permute.xlu0 %31   ;;  %v38_v21 = vpop.permute.xlu1 %37  }
  0x7d   :  { %34 = vst.msk [vmem:[#allocation0] sm:$0x1] %vm33_vm5, %v32_v20  }
  0x7e   :  { %40 = vst.msk [vmem:[#allocation0] sm:$0x1] %vm39_vm6, %v38_v21  }
  0x80   :  { %v44_v22 = vpop.permute.xlu0 %43   ;;  %v50_v23 = vpop.permute.xlu1 %49  }
  0x81   :  { %46 = vst.msk [vmem:[#allocation0] sm:$0x1] %vm45_vm7, %v44_v22  }
  0x82   :  { %52 = vst.msk [vmem:[#allocation0] sm:$0x1] %vm51_vm8, %v50_v23  }
  0x84   :  { %v56_v24 = vpop.permute.xlu0 %55   ;;  %v62_v25 = vpop.permute.xlu1 %61  }
  0x85   :  { %58 = vst.msk [vmem:[#allocation0] sm:$0x1] %vm57_vm9, %v56_v24  }
  0x86   :  { %64 = vst.msk [vmem:[#allocation0] sm:$0x1] %vm63_vm10, %v62_v25  }
  0x88   :  { %v68_v26 = vpop.permute.xlu0 %67   ;;  %v74_v27 = vpop.permute.xlu1 %73  }
  0x89   :  { %70 = vst.msk [vmem:[#allocation0] sm:$0x1] %vm69_vm11, %v68_v26  }
  0x8a   :  { %76 = vst.msk [vmem:[#allocation0] sm:$0x1] %vm75_vm12, %v74_v27  }
  0x8c   :  { %v80_v28 = vpop.permute.xlu0 %79   ;;  %v86_v29 = vpop.permute.xlu1 %85  }
  0x8d   :  { %82 = vst.msk [vmem:[#allocation0] sm:$0x1] %vm81_vm13, %v80_v28  }
  0x8e   :  { %88 = vst.msk [vmem:[#allocation0] sm:$0x1] %vm87_vm14, %v86_v29  }
  0x90   :  { %v92_v30 = vpop.permute.xlu0 %91  }
  0x91   :  { %94 = vst.msk [vmem:[#allocation0] sm:$0x1] %vm93_vm15, %v92_v30  }
  0x98   :  { %v98_v31 = vld [vmem:[#allocation0] sm:$0x1] }
  0x99   :  { %100 = vst [vmem:[%s208_s1] sm:$0x1] %v98_v31 }

// kernel: gmm_neglog_likelihood.1
= control target key start
LH: loop header
LB: loop body
LE: loop exit
PB: predicated region body
PF: predicated region fallthrough
CT: control target
= control target key end

     0   :  { %s1840_s18 = smov 0   ;;  %s2608_s0 = inlined_call_operand.vmem [shape: f32[256,128], index: 0, kind: input, shape index: {}]   ;;  %s2609_s1 = inlined_call_operand.vmem [shape: f32[128,512], index: 1, kind: input, shape index: {}]   ;;  %s2610_s2 = inlined_call_operand.vmem [shape: f32[1,512], index: 2, kind: input, shape index: {}]   ;;  %s2611_s3 = inlined_call_operand.vmem [shape: f32[512,64], index: 3, kind: input, shape index: {}]   ;;  %s2612_s4 = inlined_call_operand.vmem [shape: f32[1,64], index: 4, kind: input, shape index: {}]   ;;  %s2613_s5 = inlined_call_operand.vmem [shape: f32[2,1,128], index: 5, kind: output, shape index: {}]  }
   0x1 LB: > { %s1846_s19 = sadd.s32 4294967295, %s1807_s18   ;;  %p1463_p0 = scmp.ge.s32.totalorder %s1807_s18, 1  ;;  %s1807_s18 = sphi %s1840_s18, %s15_s18  }
   0x2   : > { %p188_p1 = scmp.lt.s32.totalorder %s1807_s18, 3 }
   0x4   : > { %p189_p2 = pnand %p1463_p0, %p188_p1 }
   0x5   : > { %v240_v0 = vld [vmem:[%s2609_s1 + $0x8] sm:$0xff] (!%p189_p2)  ;;  %v242_v2 = vld [vmem:[%s2609_s1 + $0x18] sm:$0xff] (!%p189_p2)  ;;  %v239_v5 = vld [vmem:[%s2609_s1] sm:$0xff] (!%p189_p2)  ;;  %v1809_v7 = vmov (!%p189_p2), 0.0   ;;  %s1464_s14 = sshll.u32 (!%p189_p2), %s1846_s19, 4  ;;  %vm1221_vm1 = vcmask (!%p189_p2), 523264  }
   0x6   : > { %192 = sbr.rel (%p189_p2) target bundleno = 922 (0x39a), region = 40  ;;  %v244_v1 = vld [vmem:[%s2609_s1 + $0x28] sm:$0xff] (!%p189_p2)  ;;  %v246_v4 = vld [vmem:[%s2609_s1 + $0x38] sm:$0xff] (!%p189_p2)  ;;  %v243_v6 = vld [vmem:[%s2609_s1 + $0x20] sm:$0xff] (!%p189_p2)  ;;  %389 = vmatprep.mubr.f32.mxu0 (!%p189_p2), %v1809_v7  ;;  %550 = vmatprep.mubr.f32.mxu1 (!%p189_p2), %v1809_v7  ;;  %p2005_p3 = scmp.lt.s32.totalorder (!%p189_p2), %s1464_s14, 31 }
   0x7   : > { %v1630_v3 = vpack.c.bf16 (!%p189_p2), %v244_v1, %v240_v0  ;;  %v1662_v8 = vpack.c.bf16 (!%p189_p2), %v246_v4, %v242_v2  ;;  %v1632_v9 = vpack.c.bf16 (!%p189_p2), %v243_v6, %v239_v5  ;;  %v241_v10 = vld [vmem:[%s2609_s1 + $0x10] sm:$0xff] (!%p189_p2)  ;;  %v248_v12 = vld [vmem:[%s2609_s1 + $0x48] sm:$0xff] (!%p189_p2)  ;;  %v250_v15 = vld [vmem:[%s2609_s1 + $0x58] sm:$0xff] (!%p189_p2)  ;;  %p220_p4 = scmp.lt.s32.totalorder (!%p189_p2), %s1846_s19, 1 }
   0x8   : > { %v245_v11 = vld [vmem:[%s2609_s1 + $0x30] sm:$0xff] (!%p189_p2)  ;;  %v252_v14 = vld [vmem:[%s2609_s1 + $0x68] sm:$0xff] (!%p189_p2)  ;;  %v254_v16 = vld [vmem:[%s2609_s1 + $0x78] sm:$0xff] (!%p189_p2) }
   0x9   : > { %1631 = vmatprep.subr.bf16.mxu0 (!%p189_p2), %v1630_v3  ;;  %v1664_v13 = vpack.c.bf16 (!%p189_p2), %v245_v11, %v241_v10  ;;  %1663 = vmatprep.subr.bf16.mxu1 (!%p189_p2), %v1662_v8  ;;  %v1634_v17 = vpack.c.bf16 (!%p189_p2), %v252_v14, %v248_v12  ;;  %v1666_v18 = vpack.c.bf16 (!%p189_p2), %v254_v16, %v250_v15  ;;  %v247_v19 = vld [vmem:[%s2609_s1 + $0x40] sm:$0xff] (!%p189_p2)  ;;  %v249_v21 = vld [vmem:[%s2609_s1 + $0x50] sm:$0xff] (!%p189_p2)  ;;  %v256_v24 = vld [vmem:[%s2609_s1 + $0x88] sm:$0xff] (!%p189_p2) }
   0xa   : > { %1633 = vmatpush1.bf16.msra.mxu0 (!%p189_p2), %v1632_v9  ;;  %v251_v20 = vld [vmem:[%s2609_s1 + $0x60] sm:$0xff] (!%p189_p2)  ;;  %v253_v23 = vld [vmem:[%s2609_s1 + $0x70] sm:$0xff] (!%p189_p2)  ;;  %v260_v25 = vld [vmem:[%s2609_s1 + $0xa8] sm:$0xff] (!%p189_p2) }
   0xb   : > { %1665 = vmatpush1.bf16.msra.mxu1 (!%p189_p2), %v1664_v13  ;;  %v1636_v22 = vpack.c.bf16 (!%p189_p2), %v251_v20, %v247_v19  ;;  %1635 = vmatprep.subr.bf16.mxu0 (!%p189_p2), %v1634_v17  ;;  %v1668_v26 = vpack.c.bf16 (!%p189_p2), %v253_v23, %v249_v21  ;;  %v1638_v27 = vpack.c.bf16 (!%p189_p2), %v260_v25, %v256_v24  ;;  %v258_v28 = vld [vmem:[%s2609_s1 + $0x98] sm:$0xff] (!%p189_p2)  ;;  %v255_v30 = vld [vmem:[%s2609_s1 + $0x80] sm:$0xff] (!%p189_p2)  ;;  %v257_v33 = vld [vmem:[%s2609_s1 + $0x90] sm:$0xff] (!%p189_p2) }
   0xc   : > { %1667 = vmatprep.subr.bf16.mxu1 (!%p189_p2), %v1666_v18  ;;  %v262_v29 = vld [vmem:[%s2609_s1 + $0xb8] sm:$0xff] (!%p189_p2)  ;;  %v259_v32 = vld [vmem:[%s2609_s1 + $0xa0] sm:$0xff] (!%p189_p2)  ;;  %v261_v34 = vld [vmem:[%s2609_s1 + $0xb0] sm:$0xff] (!%p189_p2) }
   0xd   : > { %v1670_v31 = vpack.c.bf16 %v262_v29, %v258_v28  ;;  %v1640_v35 = vpack.c.bf16 %v259_v32, %v255_v30  ;;  %v264_v36 = vld [vmem:[%s2609_s1 + $0xc8] sm:$0xff]  ;;  %v266_v38 = vld [vmem:[%s2609_s1 + $0xd8] sm:$0xff]  ;;  %v1672_v39 = vpack.c.bf16 %v261_v34, %v257_v33  ;;  %v263_v42 = vld [vmem:[%s2609_s1 + $0xc0] sm:$0xff]  ;;  %s2626_s14 = smov (!%p2005_p3, %s1464_s14), 31 }
   0xe   : > { %1637 = vmatpush1.bf16.msra.mxu0 %v1636_v22  ;;  %v268_v37 = vld [vmem:[%s2609_s1 + $0xe8] sm:$0xff]  ;;  %v270_v41 = vld [vmem:[%s2609_s1 + $0xf8] sm:$0xff]  ;;  %v267_v43 = vld [vmem:[%s2609_s1 + $0xe0] sm:$0xff]  ;;  %s1465_s11 = sshll.u32 %s2626_s14, 3 }
   0xf   : > { %1669 = vmatpush1.bf16.msra.mxu1 %v1668_v26  ;;  %1639 = vmatprep.subr.bf16.mxu0 %v1638_v27  ;;  %v1642_v40 = vpack.c.bf16 %v268_v37, %v264_v36  ;;  %v1674_v44 = vpack.c.bf16 %v270_v41, %v266_v38  ;;  %v265_v45 = vld [vmem:[%s2609_s1 + $0xd0] sm:$0xff]  ;;  %v272_v47 = vld [vmem:[%s2609_s1 + $0x108] sm:$0xff]  ;;  %v274_v49 = vld [vmem:[%s2609_s1 + $0x118] sm:$0xff]  ;;  %v1644_v51 = vpack.c.bf16 %v267_v43, %v263_v42  ;;  %s2070_s24 = scalar_lea.vmem %s2608_s0, %s1465_s11 }
  0x10   : > { %1671 = vmatprep.subr.bf16.mxu1 %v1670_v31  ;;  %v269_v46 = vld [vmem:[%s2609_s1 + $0xf0] sm:$0xff]  ;;  %v276_v48 = vld [vmem:[%s2609_s1 + $0x128] sm:$0xff]  ;;  %v278_v50 = vld [vmem:[%s2609_s1 + $0x138] sm:$0xff] }
  0x11   : > { %v1676_v52 = vpack.c.bf16 %v269_v46, %v265_v45  ;;  %v1646_v53 = vpack.c.bf16 %v276_v48, %v272_v47  ;;  %v271_v54 = vld [vmem:[%s2609_s1 + $0x100] sm:$0xff]  ;;  %v273_v56 = vld [vmem:[%s2609_s1 + $0x110] sm:$0xff]  ;;  %v1678_v57 = vpack.c.bf16 %v278_v50, %v274_v49  ;;  %v280_v59 = vld [vmem:[%s2609_s1 + $0x148] sm:$0xff] }
  0x12   : > { %1641 = vmatpush1.bf16.msra.mxu0 %v1640_v35  ;;  %v275_v55 = vld [vmem:[%s2609_s1 + $0x120] sm:$0xff]  ;;  %v277_v58 = vld [vmem:[%s2609_s1 + $0x130] sm:$0xff]  ;;  %v284_v60 = vld [vmem:[%s2609_s1 + $0x168] sm:$0xff] }
  0x13   : > { %1673 = vmatpush1.bf16.msra.mxu1 %v1672_v39  ;;  %1643 = vmatprep.subr.bf16.mxu0 %v1642_v40  ;;  %v282_v61 = vld [vmem:[%s2609_s1 + $0x158] sm:$0xff]  ;;  %v1648_v63 = vpack.c.bf16 %v275_v55, %v271_v54  ;;  %v1680_v0 = vpack.c.bf16 %v277_v58, %v273_v56  ;;  %v1650_v1 = vpack.c.bf16 %v284_v60, %v280_v59  ;;  %v279_v2 = vld [vmem:[%s2609_s1 + $0x140] sm:$0xff]  ;;  %v281_v4 = vld [vmem:[%s2609_s1 + $0x150] sm:$0xff] }
  0x14   : > { %1675 = vmatprep.subr.bf16.mxu1 %v1674_v44  ;;  %v286_v62 = vld [vmem:[%s2609_s1 + $0x178] sm:$0xff]  ;;  %v283_v3 = vld [vmem:[%s2609_s1 + $0x160] sm:$0xff]  ;;  %v285_v6 = vld [vmem:[%s2609_s1 + $0x170] sm:$0xff] }
  0x15   : > { %v1682_v5 = vpack.c.bf16 %v286_v62, %v282_v61  ;;  %v288_v8 = vld [vmem:[%s2609_s1 + $0x188] sm:$0xff]  ;;  %v290_v10 = vld [vmem:[%s2609_s1 + $0x198] sm:$0xff]  ;;  %v1652_v12 = vpack.c.bf16 %v283_v3, %v279_v2  ;;  %v1684_v13 = vpack.c.bf16 %v285_v6, %v281_v4  ;;  %v287_v15 = vld [vmem:[%s2609_s1 + $0x180] sm:$0xff] }
  0x16   : > { %1645 = vmatpush1.bf16.msra.mxu0 %v1644_v51  ;;  %v292_v9 = vld [vmem:[%s2609_s1 + $0x1a8] sm:$0xff]  ;;  %v294_v11 = vld [vmem:[%s2609_s1 + $0x1b8] sm:$0xff]  ;;  %v291_v16 = vld [vmem:[%s2609_s1 + $0x1a0] sm:$0xff] }
  0x17   : > { %1677 = vmatpush1.bf16.msra.mxu1 %v1676_v52  ;;  %1647 = vmatprep.subr.bf16.mxu0 %v1646_v53  ;;  %v1654_v14 = vpack.c.bf16 %v292_v9, %v288_v8  ;;  %v289_v17 = vld [vmem:[%s2609_s1 + $0x190] sm:$0xff]  ;;  %v1686_v18 = vpack.c.bf16 %v294_v11, %v290_v10  ;;  %v296_v20 = vld [vmem:[%s2609_s1 + $0x1c8] sm:$0xff]  ;;  %v298_v22 = vld [vmem:[%s2609_s1 + $0x1d8] sm:$0xff]  ;;  %v1656_v24 = vpack.c.bf16 %v291_v16, %v287_v15 }
  0x18   : > { %1679 = vmatprep.subr.bf16.mxu1 %v1678_v57  ;;  %v293_v19 = vld [vmem:[%s2609_s1 + $0x1b0] sm:$0xff]  ;;  %v300_v21 = vld [vmem:[%s2609_s1 + $0x1e8] sm:$0xff]  ;;  %v302_v23 = vld [vmem:[%s2609_s1 + $0x1f8] sm:$0xff] }
  0x19   : > { %v1688_v25 = vpack.c.bf16 %v293_v19, %v289_v17  ;;  %v1658_v26 = vpack.c.bf16 %v300_v21, %v296_v20  ;;  %v295_v27 = vld [vmem:[%s2609_s1 + $0x1c0] sm:$0xff]  ;;  %v1690_v29 = vpack.c.bf16 %v302_v23, %v298_v22  ;;  %v297_v30 = vld [vmem:[%s2609_s1 + $0x1d0] sm:$0xff]  ;;  %v728_v33 = vld [vmem:[%s2611_s3 + $0x88] sm:$0xff] }
  0x1a   : > { %1649 = vmatpush1.bf16.msra.mxu0 %v1648_v63  ;;  %v299_v28 = vld [vmem:[%s2609_s1 + $0x1e0] sm:$0xff]  ;;  %v301_v31 = vld [vmem:[%s2609_s1 + $0x1f0] sm:$0xff]  ;;  %v760_v35 = vld [vmem:[%s2611_s3 + $0x188] sm:$0xff] }
  0x1b   : > { %1681 = vmatpush1.bf16.msra.mxu1 %v1680_v0  ;;  %1651 = vmatprep.subr.bf16.mxu0 %v1650_v1  ;;  %v727_v32 = vld [vmem:[%s2611_s3 + $0x80] sm:$0xff]  ;;  %v1660_v36 = vpack.c.bf16 %v299_v28, %v295_v27  ;;  %v1692_v37 = vpack.c.bf16 %v301_v31, %v297_v30  ;;  %v712_v41 = vld [vmem:[%s2611_s3 + $0x8] sm:$0xff]  ;;  %v729_v44 = vld [vmem:[%s2611_s3 + $0x90] sm:$0xff] }
  0x1c   : > { %1683 = vmatprep.subr.bf16.mxu1 %v1682_v5  ;;  %v759_v34 = vld [vmem:[%s2611_s3 + $0x180] sm:$0xff]  ;;  %v1694_v38 = vpack.c.bf16 %v728_v33, %v727_v32  ;;  %v744_v43 = vld [vmem:[%s2611_s3 + $0x108] sm:$0xff]  ;;  %v730_v45 = vld [vmem:[%s2611_s3 + $0x98] sm:$0xff] }
  0x1d   : > { %v1726_v39 = vpack.c.bf16 %v760_v35, %v759_v34  ;;  %v711_v40 = vld [vmem:[%s2611_s3] sm:$0xff]  ;;  %v761_v47 = vld [vmem:[%s2611_s3 + $0x190] sm:$0xff]  ;;  %v762_v48 = vld [vmem:[%s2611_s3 + $0x198] sm:$0xff]  ;;  %v1698_v51 = vpack.c.bf16 %v730_v45, %v729_v44 }
  0x1e   : > { %1653 = vmatpush1.bf16.msra.mxu0 %v1652_v12  ;;  %v743_v42 = vld [vmem:[%s2611_s3 + $0x100] sm:$0xff]  ;;  %v1696_v49 = vpack.c.bf16 %v712_v41, %v711_v40  ;;  %v713_v52 = vld [vmem:[%s2611_s3 + $0x10] sm:$0xff]  ;;  %v714_v53 = vld [vmem:[%s2611_s3 + $0x18] sm:$0xff]  ;;  %v1730_v55 = vpack.c.bf16 %v762_v48, %v761_v47 }
  0x1f   : > { %1685 = vmatpush1.bf16.msra.mxu1 %v1684_v13  ;;  %1655 = vmatprep.subr.bf16.mxu0 %v1654_v14  ;;  %v223_v46 = vld [vmem:[%s2070_s24] sm:$0xff]  ;;  %v1728_v50 = vpack.c.bf16 %v744_v43, %v743_v42  ;;  %v745_v54 = vld [vmem:[%s2611_s3 + $0x110] sm:$0xff]  ;;  %v746_v56 = vld [vmem:[%s2611_s3 + $0x118] sm:$0xff]  ;;  %v1700_v62 = vpack.c.bf16 %v714_v53, %v713_v52 }
  0x20   : > { %1687 = vmatprep.subr.bf16.mxu1 %v1686_v18  ;;  %v731_v57 = vld [vmem:[%s2611_s3 + $0xa0] sm:$0xff]  ;;  %v732_v58 = vld [vmem:[%s2611_s3 + $0xa8] sm:$0xff]  ;;  %v1732_v63 = vpack.c.bf16 %v746_v56, %v745_v54  ;;  %v733_v6 = vld [vmem:[%s2611_s3 + $0xb0] sm:$0xff] }
  0x21   : > { %v224_v59 = vld [vmem:[%s2070_s24 + $0x8] sm:$0xff]  ;;  %v763_v60 = vld [vmem:[%s2611_s3 + $0x1a0] sm:$0xff]  ;;  %v1702_v0 = vpack.c.bf16 %v732_v58, %v731_v57  ;;  %v734_v8 = vld [vmem:[%s2611_s3 + $0xb8] sm:$0xff] }
  0x22   : > { %1657 = vmatpush1.bf16.msra.mxu0 %v1656_v24  ;;  %v764_v61 = vld [vmem:[%s2611_s3 + $0x1a8] sm:$0xff]  ;;  %v715_v1 = vld [vmem:[%s2611_s3 + $0x20] sm:$0xff]  ;;  %v225_v9 = vld [vmem:[%s2070_s24 + $0x10] sm:$0xff]  ;;  %v1706_v14 = vpack.c.bf16 %v734_v8, %v733_v6 }
  0x23   : > { %1689 = vmatpush1.bf16.msra.mxu1 %v1688_v25  ;;  %1659 = vmatprep.subr.bf16.mxu0 %v1658_v26  ;;  %v716_v2 = vld [vmem:[%s2611_s3 + $0x28] sm:$0xff]  ;;  %v747_v3 = vld [vmem:[%s2611_s3 + $0x120] sm:$0xff]  ;;  %v1734_v4 = vpack.c.bf16 %v764_v61, %v763_v60  ;;  %v765_v10 = vld [vmem:[%s2611_s3 + $0x1b0] sm:$0xff] }
  0x24   : > { %1691 = vmatprep.subr.bf16.mxu1 %v1690_v29  ;;  %v748_v5 = vld [vmem:[%s2611_s3 + $0x128] sm:$0xff]  ;;  %v766_v11 = vld [vmem:[%s2611_s3 + $0x1b8] sm:$0xff]  ;;  %v1704_v12 = vpack.c.bf16 %v716_v2, %v715_v1  ;;  %v717_v15 = vld [vmem:[%s2611_s3 + $0x30] sm:$0xff] }
  0x25   : > { %v1736_v13 = vpack.c.bf16 %v748_v5, %v747_v3  ;;  %v718_v16 = vld [vmem:[%s2611_s3 + $0x38] sm:$0xff]  ;;  %v749_v17 = vld [vmem:[%s2611_s3 + $0x130] sm:$0xff]  ;;  %v1738_v18 = vpack.c.bf16 %v766_v11, %v765_v10  ;;  %v735_v20 = vld [vmem:[%s2611_s3 + $0xc0] sm:$0xff] }
  0x26   : > { %1661 = vmatpush1.bf16.msra.mxu0 %v1660_v36  ;;  %v750_v19 = vld [vmem:[%s2611_s3 + $0x138] sm:$0xff]  ;;  %v736_v21 = vld [vmem:[%s2611_s3 + $0xc8] sm:$0xff]  ;;  %v767_v23 = vld [vmem:[%s2611_s3 + $0x1c0] sm:$0xff]  ;;  %v1708_v25 = vpack.c.bf16 %v718_v16, %v717_v15 }
  0x27   : > { %1693 = vmatpush1.bf16.msra.mxu1 %v1692_v37  ;;  %1695 = vmatprep.subr.bf16.mxu0 %v1694_v38  ;;  %v226_v22 = vld [vmem:[%s2070_s24 + $0x18] sm:$0xff]  ;;  %v768_v24 = vld [vmem:[%s2611_s3 + $0x1c8] sm:$0xff]  ;;  %v1740_v26 = vpack.c.bf16 %v750_v19, %v749_v17  ;;  %v1710_v27 = vpack.c.bf16 %v736_v21, %v735_v20  ;;  %v719_v28 = vld [vmem:[%s2611_s3 + $0x40] sm:$0xff]  ;;  %v305_v20 = vlaneseq }
  0x28   : > { %1727 = vmatprep.subr.bf16.mxu1 %v1726_v39  ;;  %v720_v29 = vld [vmem:[%s2611_s3 + $0x48] sm:$0xff]  ;;  %v751_v30 = vld [vmem:[%s2611_s3 + $0x140] sm:$0xff]  ;;  %v1742_v31 = vpack.c.bf16 %v768_v24, %v767_v23  ;;  %v737_v33 = vld [vmem:[%s2611_s3 + $0xd0] sm:$0xff] }
  0x29   : > { %390 = vmatmul.mubr.f32.vlgmr.msra.gmra.mrb[0].mxu0 %v223_v46  ;;  %v752_v32 = vld [vmem:[%s2611_s3 + $0x148] sm:$0xff]  ;;  %v738_v34 = vld [vmem:[%s2611_s3 + $0xd8] sm:$0xff]  ;;  %v227_v35 = vld [vmem:[%s2070_s24 + $0x20] sm:$0xff]  ;;  %v1712_v38 = vpack.c.bf16 %v720_v29, %v719_v28  ;;  %v2299_v21 = vshrl.u32 %v305_v20, 7 }
  0x2a   : > { %551 = vmatmul.mubr.f32.vlgmr.msra.gmra.mrb[0].mxu1 %v223_v46  ;;  %395 = vmatprep.mubr.f32.mxu0 %v1809_v7  ;;  %v769_v36 = vld [vmem:[%s2611_s3 + $0x1d0] sm:$0xff]  ;;  %v770_v37 = vld [vmem:[%s2611_s3 + $0x1d8] sm:$0xff]  ;;  %v1744_v39 = vpack.c.bf16 %v752_v32, %v751_v30  ;;  %v1714_v40 = vpack.c.bf16 %v738_v34, %v737_v33  ;;  %v739_v46 = vld [vmem:[%s2611_s3 + $0xe0] sm:$0xff] }
  0x2b   : > { %556 = vmatprep.mubr.f32.mxu1 %v1809_v7  ;;  %1697 = vmatpush3.bf16.msra.mxu0 %v1696_v49  ;;  %v721_v41 = vld [vmem:[%s2611_s3 + $0x50] sm:$0xff]  ;;  %v722_v42 = vld [vmem:[%s2611_s3 + $0x58] sm:$0xff]  ;;  %v1746_v44 = vpack.c.bf16 %v770_v37, %v769_v36  ;;  %v740_v47 = vld [vmem:[%s2611_s3 + $0xe8] sm:$0xff]  ;;  %v315_v24 = vsub.s32 2, %v2299_v21 }
  0x2c   : > { %1729 = vmatpush3.bf16.msra.mxu1 %v1728_v50  ;;  %1699 = vmatprep.subr.bf16.mxu0 %v1698_v51  ;;  %v753_v43 = vld [vmem:[%s2611_s3 + $0x150] sm:$0xff]  ;;  %v754_v45 = vld [vmem:[%s2611_s3 + $0x158] sm:$0xff]  ;;  %v228_v48 = vld [vmem:[%s2070_s24 + $0x28] sm:$0xff]  ;;  %v1716_v51 = vpack.c.bf16 %v722_v42, %v721_v41  ;;  %v1718_v53 = vpack.c.bf16 %v740_v47, %v739_v46 }
  0x2d   : > { %396 = vmatmul.mubr.f32.gmra.mrb[2].mxu0 %v224_v59  ;;  %1731 = vmatprep.subr.bf16.mxu1 %v1730_v55  ;;  %v771_v49 = vld [vmem:[%s2611_s3 + $0x1e0] sm:$0xff]  ;;  %v772_v50 = vld [vmem:[%s2611_s3 + $0x1e8] sm:$0xff]  ;;  %v1748_v52 = vpack.c.bf16 %v754_v45, %v753_v43  ;;  %v742_v60 = vld [vmem:[%s2611_s3 + $0xf8] sm:$0xff] }
  0x2e   : > { %557 = vmatmul.mubr.f32.gmra.mrb[2].mxu1 %v224_v59  ;;  %401 = vmatprep.mubr.f32.mxu0 %v1809_v7  ;;  %v723_v54 = vld [vmem:[%s2611_s3 + $0x60] sm:$0xff]  ;;  %v724_v55 = vld [vmem:[%s2611_s3 + $0x68] sm:$0xff]  ;;  %v1750_v57 = vpack.c.bf16 %v772_v50, %v771_v49  ;;  %v741_v59 = vld [vmem:[%s2611_s3 + $0xf0] sm:$0xff] }
  0x2f   : > { %562 = vmatprep.mubr.f32.mxu1 %v1809_v7  ;;  %1701 = vmatpush3.bf16.msra.mxu0 %v1700_v62  ;;  %v755_v56 = vld [vmem:[%s2611_s3 + $0x160] sm:$0xff]  ;;  %v756_v58 = vld [vmem:[%s2611_s3 + $0x168] sm:$0xff]  ;;  %v229_v61 = vld [vmem:[%s2070_s24 + $0x30] sm:$0xff]  ;;  %v1722_v2 = vpack.c.bf16 %v742_v60, %v741_v59 }
  0x30   : > { %1733 = vmatpush3.bf16.msra.mxu1 %v1732_v63  ;;  %1703 = vmatprep.subr.bf16.mxu0 %v1702_v0  ;;  %v773_v62 = vld [vmem:[%s2611_s3 + $0x1f0] sm:$0xff]  ;;  %v774_v63 = vld [vmem:[%s2611_s3 + $0x1f8] sm:$0xff]  ;;  %v1720_v0 = vpack.c.bf16 %v724_v55, %v723_v54  ;;  %v1752_v1 = vpack.c.bf16 %v756_v58, %v755_v56  ;;  %v235_v16 = vld [vmem:[%s2070_s24 + $0x60] sm:$0xff] }
  0x31   : > { %402 = vmatmul.mubr.f32.gmra.mrb[4].mxu0 %v225_v9  ;;  %1735 = vmatprep.subr.bf16.mxu1 %v1734_v4  ;;  %v725_v3 = vld [vmem:[%s2611_s3 + $0x70] sm:$0xff]  ;;  %v726_v4 = vld [vmem:[%s2611_s3 + $0x78] sm:$0xff]  ;;  %v1754_v5 = vpack.c.bf16 %v774_v63, %v773_v62  ;;  %v236_v17 = vld [vmem:[%s2070_s24 + $0x68] sm:$0xff] }
  0x32   : > { %563 = vmatmul.mubr.f32.gmra.mrb[4].mxu1 %v225_v9  ;;  %407 = vmatprep.mubr.f32.mxu0 %v1809_v7  ;;  %v757_v6 = vld [vmem:[%s2611_s3 + $0x170] sm:$0xff]  ;;  %v758_v8 = vld [vmem:[%s2611_s3 + $0x178] sm:$0xff]  ;;  %v1724_v10 = vpack.c.bf16 %v726_v4, %v725_v3  ;;  %v303_v23 = vld [vmem:[%s2610_s2] sm:$0xf] }
  0x33   : > { %568 = vmatprep.mubr.f32.mxu1 %v1809_v7  ;;  %1705 = vmatpush3.bf16.msra.mxu0 %v1704_v12  ;;  %v230_v9 = vld [vmem:[%s2070_s24 + $0x38] sm:$0xff]  ;;  %v1756_v11 = vpack.c.bf16 %v758_v8, %v757_v6  ;;  %v231_v12 = vld [vmem:[%s2070_s24 + $0x40] sm:$0xff] }
  0x34   : > { %1737 = vmatpush3.bf16.msra.mxu1 %v1736_v13  ;;  %1707 = vmatprep.subr.bf16.mxu0 %v1706_v14  ;;  %v232_v13 = vld [vmem:[%s2070_s24 + $0x48] sm:$0xff]  ;;  %v233_v14 = vld [vmem:[%s2070_s24 + $0x50] sm:$0xff]  ;;  %v234_v15 = vld [vmem:[%s2070_s24 + $0x58] sm:$0xff] }
  0x35   : > { %408 = vmatmul.mubr.f32.gmra.mrb[6].mxu0 %v226_v22  ;;  %1739 = vmatprep.subr.bf16.mxu1 %v1738_v18  ;;  %v237_v18 = vld [vmem:[%s2070_s24 + $0x70] sm:$0xff]  ;;  %v238_v19 = vld [vmem:[%s2070_s24 + $0x78] sm:$0xff]  ;;  %s1467_s24 = sshll.u32 %s1846_s19, 7  ;;  %s2628_s19 = smov (!%p220_p4, %s1846_s19), 1 }
  0x36   : > { %569 = vmatmul.mubr.f32.gmra.mrb[6].mxu1 %v226_v22  ;;  %413 = vmatprep.mubr.f32.mxu0 %v1809_v7  ;;  %v307_v22 = vsub.s32 0, %v2299_v21  ;;  %s222_s17 = scalar_lea.vmem %s2613_s5, %s2628_s19 }
  0x37   : > { %574 = vmatprep.mubr.f32.mxu1 %v1809_v7  ;;  %1709 = vmatpush3.bf16.msra.mxu0 %v1708_v25  ;;  %v311_v25 = vsub.s32 1, %v2299_v21 }
  0x38   : > { %1741 = vmatpush3.bf16.msra.mxu1 %v1740_v26  ;;  %1711 = vmatprep.subr.bf16.mxu0 %v1710_v27  ;;  %v319_v26 = vsub.s32 3, %v2299_v21  ;;  %v2308_v27 = vrot.slane %v303_v23, %v307_v22 }
  0x39   : > { %414 = vmatmul.mubr.f32.gmra.mrb[8].mxu0 %v227_v35  ;;  %1743 = vmatprep.subr.bf16.mxu1 %v1742_v31  ;;  %v2312_v28 = vrot.slane %v303_v23, %v311_v25 }
  0x3a   : > { %575 = vmatmul.mubr.f32.gmra.mrb[8].mxu1 %v227_v35  ;;  %419 = vmatprep.mubr.f32.mxu0 %v1809_v7  ;;  %v2314_v29 = vrot.slane %v303_v23, %v319_v26 }
  0x3b   : > { %580 = vmatprep.mubr.f32.mxu1 %v1809_v7  ;;  %1713 = vmatpush3.bf16.msra.mxu0 %v1712_v38 }
  0x3c   : > { %1745 = vmatpush3.bf16.msra.mxu1 %v1744_v39  ;;  %1715 = vmatprep.subr.bf16.mxu0 %v1714_v40 }
  0x3d   : > { %420 = vmatmul.mubr.f32.gmra.mrb[10].mxu0 %v228_v48  ;;  %1747 = vmatprep.subr.bf16.mxu1 %v1746_v44 }
  0x3e   : > { %581 = vmatmul.mubr.f32.gmra.mrb[10].mxu1 %v228_v48  ;;  %425 = vmatprep.mubr.f32.mxu0 %v1809_v7 }
  0x3f   : > { %586 = vmatprep.mubr.f32.mxu1 %v1809_v7  ;;  %1717 = vmatpush3.bf16.msra.mxu0 %v1716_v51 }
  0x40   : > { %1749 = vmatpush3.bf16.msra.mxu1 %v1748_v52  ;;  %1719 = vmatprep.subr.bf16.mxu0 %v1718_v53 }
  0x41   : > { %426 = vmatmul.mubr.f32.gmra.mrb[12].mxu0 %v229_v61  ;;  %1751 = vmatprep.subr.bf16.mxu1 %v1750_v57 }
  0x42   : > { %587 = vmatmul.mubr.f32.gmra.mrb[12].mxu1 %v229_v61  ;;  %431 = vmatprep.mubr.f32.mxu0 %v1809_v7 }
  0x43   : > { %592 = vmatprep.mubr.f32.mxu1 %v1809_v7  ;;  %1721 = vmatpush3.bf16.msra.mxu0 %v1720_v0 }
  0x44   : > { %1753 = vmatpush3.bf16.msra.mxu1 %v1752_v1  ;;  %1723 = vmatprep.subr.bf16.mxu0 %v1722_v2 }
  0x45   : > { %432 = vmatmul.mubr.f32.gmra.mrb[14].mxu0 %v230_v9  ;;  %1755 = vmatprep.subr.bf16.mxu1 %v1754_v5 }
  0x46   : > { %593 = vmatmul.mubr.f32.gmra.mrb[14].mxu1 %v230_v9  ;;  %437 = vmatprep.mubr.f32.mxu0 %v1809_v7 }
  0x47   : > { %598 = vmatprep.mubr.f32.mxu1 %v1809_v7  ;;  %1725 = vmatpush3.bf16.msra.mxu0 %v1724_v10 }
  0x48   : > { %1757 = vmatpush3.bf16.msra.mxu1 %v1756_v11 }
  0x49   : > { %438 = vmatmul.mubr.f32.gmra.mrb[16].mxu0 %v231_v12 }
  0x4a   : > { %599 = vmatmul.mubr.f32.gmra.mrb[16].mxu1 %v231_v12  ;;  %443 = vmatprep.mubr.f32.mxu0 %v1809_v7 }
  0x4b   : > { %604 = vmatprep.mubr.f32.mxu1 %v1809_v7 }
  0x4d   : > { %444 = vmatmul.mubr.f32.gmra.mrb[18].mxu0 %v232_v13 }
  0x4e   : > { %605 = vmatmul.mubr.f32.gmra.mrb[18].mxu1 %v232_v13  ;;  %449 = vmatprep.mubr.f32.mxu0 %v1809_v7 }
  0x4f   : > { %610 = vmatprep.mubr.f32.mxu1 %v1809_v7 }
  0x51   : > { %450 = vmatmul.mubr.f32.gmra.mrb[20].mxu0 %v233_v14 }
  0x52   : > { %611 = vmatmul.mubr.f32.gmra.mrb[20].mxu1 %v233_v14  ;;  %455 = vmatprep.mubr.f32.mxu0 %v1809_v7 }
  0x53   : > { %616 = vmatprep.mubr.f32.mxu1 %v1809_v7 }
  0x55   : > { %456 = vmatmul.mubr.f32.gmra.mrb[22].mxu0 %v234_v15 }
  0x56   : > { %617 = vmatmul.mubr.f32.gmra.mrb[22].mxu1 %v234_v15  ;;  %461 = vmatprep.mubr.f32.mxu0 %v1809_v7 }
  0x57   : > { %622 = vmatprep.mubr.f32.mxu1 %v1809_v7 }
  0x59   : > { %462 = vmatmul.mubr.f32.gmra.mrb[24].mxu0 %v235_v16 }
  0x5a   : > { %623 = vmatmul.mubr.f32.gmra.mrb[24].mxu1 %v235_v16  ;;  %467 = vmatprep.mubr.f32.mxu0 %v1809_v7 }
  0x5b   : > { %628 = vmatprep.mubr.f32.mxu1 %v1809_v7 }
  0x5d   : > { %468 = vmatmul.mubr.f32.gmra.mrb[26].mxu0 %v236_v17 }
  0x5e   : > { %629 = vmatmul.mubr.f32.gmra.mrb[26].mxu1 %v236_v17  ;;  %473 = vmatprep.mubr.f32.mxu0 %v1809_v7 }
  0x5f   : > { %634 = vmatprep.mubr.f32.mxu1 %v1809_v7 }
  0x61   : > { %474 = vmatmul.mubr.f32.gmra.mrb[28].mxu0 %v237_v18 }
  0x62   : > { %635 = vmatmul.mubr.f32.gmra.mrb[28].mxu1 %v237_v18  ;;  %479 = vmatprep.mubr.f32.mxu0 %v1809_v7 }
  0x63   : > { %640 = vmatprep.mubr.f32.mxu1 %v1809_v7  ;;  %v2310_v7 = vrot.slane %v303_v23, %v315_v24 }
  0x65   : > { %480 = vmatmul.mubr.f32.gmra.mrb[30].mxu0 %v238_v19 }
  0x66   : > { %641 = vmatmul.mubr.f32.gmra.mrb[30].mxu1 %v238_v19 }
  0xfc   : > { %v391_v30 = vpop.f32.mrb[0].mxu0 }
  0xfd   : > { %v392_v31 = vadd.f32 %v391_v30, %v2308_v27  ;;  %v552_v32 = vpop.f32.mrb[0].mxu1  ;;  %v393_v33 = vpop.f32.mrb[1].mxu0 }
  0xfe   : > { %v553_v34 = vadd.f32 %v552_v32, %v2310_v7  ;;  %v394_v35 = vadd.f32 %v393_v33, %v2312_v28  ;;  %v554_v36 = vpop.f32.mrb[1].mxu1 }
  0xff   : > { %v555_v37 = vadd.f32 %v554_v36, %v2314_v29  ;;  %v647_v40 = vmul.f32 %v392_v31, %v392_v31 }
 0x100   : > { %v648_v38 = vmul.f32 %v394_v35, %v394_v35  ;;  %v397_v39 = vpop.f32.mrb[2].mxu0  ;;  %v649_v45 = vmul.f32 %v553_v34, %v553_v34 }
 0x101   : > { %v650_v41 = vmul.f32 %v555_v37, %v555_v37  ;;  %v398_v42 = vadd.f32 %v397_v39, %v2308_v27  ;;  %v558_v43 = vpop.f32.mrb[2].mxu1  ;;  %v399_v44 = vpop.f32.mrb[3].mxu0 }
 0x102   : > { %v559_v46 = vadd.f32 %v558_v43, %v2310_v7  ;;  %v400_v47 = vadd.f32 %v399_v44, %v2312_v28  ;;  %v560_v48 = vpop.f32.mrb[3].mxu1  ;;  %839 = vmatprep.mubr.f32.mxu0 %v648_v38 }
 0x103   : > { %v561_v49 = vadd.f32 %v560_v48, %v2314_v29  ;;  %984 = vmatprep.mubr.f32.mxu1 %v650_v41  ;;  %840 = vmatmul.mubr.f32.vlgmr.msra.gmra.mrb[32].mxu0 %v647_v40  ;;  %v651_v52 = vmul.f32 %v398_v42, %v398_v42 }
 0x104   : > { %v652_v50 = vmul.f32 %v400_v47, %v400_v47  ;;  %985 = vmatmul.mubr.f32.vlgmr.msra.gmra.mrb[32].mxu1 %v649_v45  ;;  %v403_v51 = vpop.f32.mrb[4].mxu0  ;;  %v653_v57 = vmul.f32 %v559_v46, %v559_v46 }
 0x105   : > { %v654_v53 = vmul.f32 %v561_v49, %v561_v49  ;;  %v404_v54 = vadd.f32 %v403_v51, %v2308_v27  ;;  %v564_v55 = vpop.f32.mrb[4].mxu1  ;;  %v405_v56 = vpop.f32.mrb[5].mxu0 }
 0x106   : > { %v565_v58 = vadd.f32 %v564_v55, %v2310_v7  ;;  %v406_v59 = vadd.f32 %v405_v56, %v2312_v28  ;;  %v566_v60 = vpop.f32.mrb[5].mxu1  ;;  %844 = vmatprep.mubr.f32.mxu0 %v652_v50 }
 0x107   : > { %v567_v61 = vadd.f32 %v566_v60, %v2314_v29  ;;  %989 = vmatprep.mubr.f32.mxu1 %v654_v53  ;;  %845 = vmatmul.mubr.f32.gmra.mrb[34].mxu0 %v651_v52  ;;  %v655_v0 = vmul.f32 %v404_v54, %v404_v54 }
 0x108   : > { %v656_v62 = vmul.f32 %v406_v59, %v406_v59  ;;  %990 = vmatmul.mubr.f32.gmra.mrb[34].mxu1 %v653_v57  ;;  %v409_v63 = vpop.f32.mrb[6].mxu0  ;;  %v657_v5 = vmul.f32 %v565_v58, %v565_v58 }
 0x109   : > { %v658_v1 = vmul.f32 %v567_v61, %v567_v61  ;;  %v410_v2 = vadd.f32 %v409_v63, %v2308_v27  ;;  %v570_v3 = vpop.f32.mrb[6].mxu1  ;;  %v411_v4 = vpop.f32.mrb[7].mxu0 }
 0x10a   : > { %v571_v6 = vadd.f32 %v570_v3, %v2310_v7  ;;  %v412_v8 = vadd.f32 %v411_v4, %v2312_v28  ;;  %v572_v9 = vpop.f32.mrb[7].mxu1  ;;  %849 = vmatprep.mubr.f32.mxu0 %v656_v62 }
 0x10b   : > { %v573_v10 = vadd.f32 %v572_v9, %v2314_v29  ;;  %994 = vmatprep.mubr.f32.mxu1 %v658_v1  ;;  %850 = vmatmul.mubr.f32.gmra.mrb[36].mxu0 %v655_v0  ;;  %v659_v13 = vmul.f32 %v410_v2, %v410_v2 }
 0x10c   : > { %v660_v11 = vmul.f32 %v412_v8, %v412_v8  ;;  %995 = vmatmul.mubr.f32.gmra.mrb[36].mxu1 %v657_v5  ;;  %v415_v12 = vpop.f32.mrb[8].mxu0  ;;  %v661_v18 = vmul.f32 %v571_v6, %v571_v6 }
 0x10d   : > { %v662_v14 = vmul.f32 %v573_v10, %v573_v10  ;;  %v416_v15 = vadd.f32 %v415_v12, %v2308_v27  ;;  %v576_v16 = vpop.f32.mrb[8].mxu1  ;;  %v417_v17 = vpop.f32.mrb[9].mxu0 }
 0x10e   : > { %v577_v19 = vadd.f32 %v576_v16, %v2310_v7  ;;  %v418_v22 = vadd.f32 %v417_v17, %v2312_v28  ;;  %v578_v23 = vpop.f32.mrb[9].mxu1  ;;  %854 = vmatprep.mubr.f32.mxu0 %v660_v11 }
 0x10f   : > { %v579_v24 = vadd.f32 %v578_v23, %v2314_v29  ;;  %999 = vmatprep.mubr.f32.mxu1 %v662_v14  ;;  %855 = vmatmul.mubr.f32.gmra.mrb[38].mxu0 %v659_v13  ;;  %v663_v30 = vmul.f32 %v416_v15, %v416_v15 }
 0x110   : > { %v664_v25 = vmul.f32 %v418_v22, %v418_v22  ;;  %1000 = vmatmul.mubr.f32.gmra.mrb[38].mxu1 %v661_v18  ;;  %v421_v26 = vpop.f32.mrb[10].mxu0  ;;  %v665_v35 = vmul.f32 %v577_v19, %v577_v19 }
 0x111   : > { %v666_v31 = vmul.f32 %v579_v24, %v579_v24  ;;  %v422_v32 = vadd.f32 %v421_v26, %v2308_v27  ;;  %v582_v33 = vpop.f32.mrb[10].mxu1  ;;  %v423_v34 = vpop.f32.mrb[11].mxu0 }
 0x112   : > { %v583_v36 = vadd.f32 %v582_v33, %v2310_v7  ;;  %v424_v37 = vadd.f32 %v423_v34, %v2312_v28  ;;  %v584_v38 = vpop.f32.mrb[11].mxu1  ;;  %859 = vmatprep.mubr.f32.mxu0 %v664_v25 }
 0x113   : > { %v585_v39 = vadd.f32 %v584_v38, %v2314_v29  ;;  %1004 = vmatprep.mubr.f32.mxu1 %v666_v31  ;;  %860 = vmatmul.mubr.f32.gmra.mrb[40].mxu0 %v663_v30  ;;  %v667_v42 = vmul.f32 %v422_v32, %v422_v32 }
 0x114   : > { %v668_v40 = vmul.f32 %v424_v37, %v424_v37  ;;  %1005 = vmatmul.mubr.f32.gmra.mrb[40].mxu1 %v665_v35  ;;  %v427_v41 = vpop.f32.mrb[12].mxu0  ;;  %v669_v47 = vmul.f32 %v583_v36, %v583_v36 }
 0x115   : > { %v670_v43 = vmul.f32 %v585_v39, %v585_v39  ;;  %v428_v44 = vadd.f32 %v427_v41, %v2308_v27  ;;  %v588_v45 = vpop.f32.mrb[12].mxu1  ;;  %v429_v46 = vpop.f32.mrb[13].mxu0 }
 0x116   : > { %v589_v48 = vadd.f32 %v588_v45, %v2310_v7  ;;  %v430_v49 = vadd.f32 %v429_v46, %v2312_v28  ;;  %v590_v50 = vpop.f32.mrb[13].mxu1  ;;  %864 = vmatprep.mubr.f32.mxu0 %v668_v40 }
 0x117   : > { %v591_v51 = vadd.f32 %v590_v50, %v2314_v29  ;;  %1009 = vmatprep.mubr.f32.mxu1 %v670_v43  ;;  %865 = vmatmul.mubr.f32.gmra.mrb[42].mxu0 %v667_v42  ;;  %v671_v54 = vmul.f32 %v428_v44, %v428_v44 }
 0x118   : > { %v672_v52 = vmul.f32 %v430_v49, %v430_v49  ;;  %1010 = vmatmul.mubr.f32.gmra.mrb[42].mxu1 %v669_v47  ;;  %v433_v53 = vpop.f32.mrb[14].mxu0  ;;  %v673_v59 = vmul.f32 %v589_v48, %v589_v48 }
 0x119   : > { %v674_v55 = vmul.f32 %v591_v51, %v591_v51  ;;  %v434_v56 = vadd.f32 %v433_v53, %v2308_v27  ;;  %v594_v57 = vpop.f32.mrb[14].mxu1  ;;  %v435_v58 = vpop.f32.mrb[15].mxu0 }
 0x11a   : > { %v595_v60 = vadd.f32 %v594_v57, %v2310_v7  ;;  %v436_v61 = vadd.f32 %v435_v58, %v2312_v28  ;;  %v596_v62 = vpop.f32.mrb[15].mxu1  ;;  %869 = vmatprep.mubr.f32.mxu0 %v672_v52 }
 0x11b   : > { %v597_v63 = vadd.f32 %v596_v62, %v2314_v29  ;;  %1014 = vmatprep.mubr.f32.mxu1 %v674_v55  ;;  %870 = vmatmul.mubr.f32.gmra.mrb[44].mxu0 %v671_v54  ;;  %v675_v2 = vmul.f32 %v434_v56, %v434_v56 }
 0x11c   : > { %v676_v0 = vmul.f32 %v436_v61, %v436_v61  ;;  %1015 = vmatmul.mubr.f32.gmra.mrb[44].mxu1 %v673_v59  ;;  %v439_v1 = vpop.f32.mrb[16].mxu0  ;;  %v677_v8 = vmul.f32 %v595_v60, %v595_v60 }
 0x11d   : > { %v678_v3 = vmul.f32 %v597_v63, %v597_v63  ;;  %v440_v4 = vadd.f32 %v439_v1, %v2308_v27  ;;  %v600_v5 = vpop.f32.mrb[16].mxu1  ;;  %v441_v6 = vpop.f32.mrb[17].mxu0 }
 0x11e   : > { %v601_v9 = vadd.f32 %v600_v5, %v2310_v7  ;;  %v442_v10 = vadd.f32 %v441_v6, %v2312_v28  ;;  %v602_v11 = vpop.f32.mrb[17].mxu1  ;;  %874 = vmatprep.mubr.f32.mxu0 %v676_v0 }
 0x11f   : > { %v603_v12 = vadd.f32 %v602_v11, %v2314_v29  ;;  %1019 = vmatprep.mubr.f32.mxu1 %v678_v3  ;;  %875 = vmatmul.mubr.f32.gmra.mrb[46].mxu0 %v675_v2  ;;  %v679_v15 = vmul.f32 %v440_v4, %v440_v4 }
 0x120   : > { %v680_v13 = vmul.f32 %v442_v10, %v442_v10  ;;  %1020 = vmatmul.mubr.f32.gmra.mrb[46].mxu1 %v677_v8  ;;  %v445_v14 = vpop.f32.mrb[18].mxu0  ;;  %v681_v22 = vmul.f32 %v601_v9, %v601_v9 }
 0x121   : > { %v682_v16 = vmul.f32 %v603_v12, %v603_v12  ;;  %v446_v17 = vadd.f32 %v445_v14, %v2308_v27  ;;  %v606_v18 = vpop.f32.mrb[18].mxu1  ;;  %v447_v19 = vpop.f32.mrb[19].mxu0 }
 0x122   : > { %v607_v23 = vadd.f32 %v606_v18, %v2310_v7  ;;  %v448_v24 = vadd.f32 %v447_v19, %v2312_v28  ;;  %v608_v25 = vpop.f32.mrb[19].mxu1  ;;  %879 = vmatprep.mubr.f32.mxu0 %v680_v13 }
 0x123   : > { %v609_v26 = vadd.f32 %v608_v25, %v2314_v29  ;;  %1024 = vmatprep.mubr.f32.mxu1 %v682_v16  ;;  %880 = vmatmul.mubr.f32.gmra.mrb[48].mxu0 %v679_v15  ;;  %v683_v32 = vmul.f32 %v446_v17, %v446_v17 }
 0x124   : > { %v684_v30 = vmul.f32 %v448_v24, %v448_v24  ;;  %1025 = vmatmul.mubr.f32.gmra.mrb[48].mxu1 %v681_v22  ;;  %v451_v31 = vpop.f32.mrb[20].mxu0  ;;  %v685_v37 = vmul.f32 %v607_v23, %v607_v23 }
 0x125   : > { %v686_v33 = vmul.f32 %v609_v26, %v609_v26  ;;  %v452_v34 = vadd.f32 %v451_v31, %v2308_v27  ;;  %v612_v35 = vpop.f32.mrb[20].mxu1  ;;  %v453_v36 = vpop.f32.mrb[21].mxu0 }
 0x126   : > { %v613_v38 = vadd.f32 %v612_v35, %v2310_v7  ;;  %v454_v39 = vadd.f32 %v453_v36, %v2312_v28  ;;  %v614_v40 = vpop.f32.mrb[21].mxu1  ;;  %884 = vmatprep.mubr.f32.mxu0 %v684_v30 }
 0x127   : > { %v615_v41 = vadd.f32 %v614_v40, %v2314_v29  ;;  %1029 = vmatprep.mubr.f32.mxu1 %v686_v33  ;;  %885 = vmatmul.mubr.f32.gmra.mrb[50].mxu0 %v683_v32  ;;  %v687_v44 = vmul.f32 %v452_v34, %v452_v34 }
 0x128   : > { %v688_v42 = vmul.f32 %v454_v39, %v454_v39  ;;  %1030 = vmatmul.mubr.f32.gmra.mrb[50].mxu1 %v685_v37  ;;  %v457_v43 = vpop.f32.mrb[22].mxu0  ;;  %v689_v49 = vmul.f32 %v613_v38, %v613_v38 }
 0x129   : > { %v690_v45 = vmul.f32 %v615_v41, %v615_v41  ;;  %v458_v46 = vadd.f32 %v457_v43, %v2308_v27  ;;  %v618_v47 = vpop.f32.mrb[22].mxu1  ;;  %v459_v48 = vpop.f32.mrb[23].mxu0 }
 0x12a   : > { %v619_v50 = vadd.f32 %v618_v47, %v2310_v7  ;;  %v460_v51 = vadd.f32 %v459_v48, %v2312_v28  ;;  %v620_v52 = vpop.f32.mrb[23].mxu1  ;;  %889 = vmatprep.mubr.f32.mxu0 %v688_v42 }
 0x12b   : > { %v621_v53 = vadd.f32 %v620_v52, %v2314_v29  ;;  %1034 = vmatprep.mubr.f32.mxu1 %v690_v45  ;;  %890 = vmatmul.mubr.f32.gmra.mrb[52].mxu0 %v687_v44  ;;  %v691_v56 = vmul.f32 %v458_v46, %v458_v46 }
 0x12c   : > { %v692_v54 = vmul.f32 %v460_v51, %v460_v51  ;;  %1035 = vmatmul.mubr.f32.gmra.mrb[52].mxu1 %v689_v49  ;;  %v463_v55 = vpop.f32.mrb[24].mxu0  ;;  %v693_v61 = vmul.f32 %v619_v50, %v619_v50  ;;  %v1107_v49 = vadd.s32 16, %v2299_v21 }
 0x12d   : > { %v694_v57 = vmul.f32 %v621_v53, %v621_v53  ;;  %v464_v58 = vadd.f32 %v463_v55, %v2308_v27  ;;  %v624_v59 = vpop.f32.mrb[24].mxu1  ;;  %v465_v60 = vpop.f32.mrb[25].mxu0 }
 0x12e   : > { %v625_v62 = vadd.f32 %v624_v59, %v2310_v7  ;;  %v466_v63 = vadd.f32 %v465_v60, %v2312_v28  ;;  %v626_v0 = vpop.f32.mrb[25].mxu1  ;;  %894 = vmatprep.mubr.f32.mxu0 %v692_v54  ;;  %v1108_v54 = vadd.s32 24, %v2299_v21  ;;  %v1109_v59 = vadd.s32 32, %v2299_v21 }
 0x12f   : > { %v627_v1 = vadd.f32 %v626_v0, %v2314_v29  ;;  %1039 = vmatprep.mubr.f32.mxu1 %v694_v57  ;;  %895 = vmatmul.mubr.f32.gmra.mrb[54].mxu0 %v691_v56  ;;  %v695_v4 = vmul.f32 %v464_v58, %v464_v58 }
 0x130   : > { %v696_v2 = vmul.f32 %v466_v63, %v466_v63  ;;  %1040 = vmatmul.mubr.f32.gmra.mrb[54].mxu1 %v693_v61  ;;  %v469_v3 = vpop.f32.mrb[26].mxu0  ;;  %v697_v10 = vmul.f32 %v625_v62, %v625_v62  ;;  %v2392_v61 = vand.u32 127, %v305_v20  ;;  %v1110_v20 = vadd.s32 40, %v2299_v21 }
 0x131   : > { %v698_v5 = vmul.f32 %v627_v1, %v627_v1  ;;  %v470_v6 = vadd.f32 %v469_v3, %v2308_v27  ;;  %v630_v8 = vpop.f32.mrb[26].mxu1  ;;  %v471_v9 = vpop.f32.mrb[27].mxu0 }
 0x132   : > { %v631_v11 = vadd.f32 %v630_v8, %v2310_v7  ;;  %v472_v12 = vadd.f32 %v471_v9, %v2312_v28  ;;  %v632_v13 = vpop.f32.mrb[27].mxu1  ;;  %899 = vmatprep.mubr.f32.mxu0 %v696_v2  ;;  %v2398_v9 = vld [vmem:[%s2612_s4] ss:$0 sm:$0xff] }
 0x133   : > { %v633_v14 = vadd.f32 %v632_v13, %v2314_v29  ;;  %1044 = vmatprep.mubr.f32.mxu1 %v698_v5  ;;  %900 = vmatmul.mubr.f32.gmra.mrb[56].mxu0 %v695_v4  ;;  %v699_v17 = vmul.f32 %v470_v6, %v470_v6 }
 0x134   : > { %v700_v15 = vmul.f32 %v472_v12, %v472_v12  ;;  %1045 = vmatmul.mubr.f32.gmra.mrb[56].mxu1 %v697_v10  ;;  %v475_v16 = vpop.f32.mrb[28].mxu0  ;;  %v701_v24 = vmul.f32 %v631_v11, %v631_v11 }
 0x135   : > { %v702_v18 = vmul.f32 %v633_v14, %v633_v14  ;;  %v476_v19 = vadd.f32 %v475_v16, %v2308_v27  ;;  %v636_v22 = vpop.f32.mrb[28].mxu1  ;;  %v477_v23 = vpop.f32.mrb[29].mxu0 }
 0x136   : > { %v637_v25 = vadd.f32 %v636_v22, %v2310_v7  ;;  %v478_v26 = vadd.f32 %v477_v23, %v2312_v28  ;;  %v638_v30 = vpop.f32.mrb[29].mxu1  ;;  %904 = vmatprep.mubr.f32.mxu0 %v700_v15 }
 0x137   : > { %v639_v31 = vadd.f32 %v638_v30, %v2314_v29  ;;  %1049 = vmatprep.mubr.f32.mxu1 %v702_v18  ;;  %905 = vmatmul.mubr.f32.gmra.mrb[58].mxu0 %v699_v17  ;;  %v703_v34 = vmul.f32 %v476_v19, %v476_v19 }
 0x138   : > { %v704_v32 = vmul.f32 %v478_v26, %v478_v26  ;;  %1050 = vmatmul.mubr.f32.gmra.mrb[58].mxu1 %v701_v24  ;;  %v481_v33 = vpop.f32.mrb[30].mxu0  ;;  %v705_v39 = vmul.f32 %v637_v25, %v637_v25 }
 0x139   : > { %v706_v35 = vmul.f32 %v639_v31, %v639_v31  ;;  %v482_v36 = vadd.f32 %v481_v33, %v2308_v27  ;;  %v642_v37 = vpop.f32.mrb[30].mxu1  ;;  %v483_v38 = vpop.f32.mrb[31].mxu0  ;;  %v2381_v27 = vstv %s1467_s24  ;;  %v1111_v33 = vadd.s32 48, %v2299_v21 }
 0x13a   : > { %v643_v40 = vadd.f32 %v642_v37, %v2310_v7  ;;  %v484_v41 = vadd.f32 %v483_v38, %v2312_v28  ;;  %v644_v42 = vpop.f32.mrb[31].mxu1  ;;  %909 = vmatprep.mubr.f32.mxu0 %v704_v32  ;;  %v1125_v7 = vadd.s32 %v2381_v27, %v2299_v21  ;;  %v1106_v28 = vadd.s32 8, %v2299_v21 }
 0x13b   : > { %v645_v43 = vadd.f32 %v644_v42, %v2314_v29  ;;  %1054 = vmatprep.mubr.f32.mxu1 %v706_v35  ;;  %910 = vmatmul.mubr.f32.gmra.mrb[60].mxu0 %v703_v34  ;;  %v707_v45 = vmul.f32 %v482_v36, %v482_v36  ;;  %v1127_v53 = vadd.s32 %v2381_v27, %v1107_v49 }
 0x13c   : > { %v708_v44 = vmul.f32 %v484_v41, %v484_v41  ;;  %1055 = vmatmul.mubr.f32.gmra.mrb[60].mxu1 %v705_v39  ;;  %v709_v47 = vmul.f32 %v643_v40, %v643_v40  ;;  %v1141_v29 = vmul.u32 16, %v1125_v7  ;;  %v1126_v48 = vadd.s32 %v2381_v27, %v1106_v28 }
 0x13d   : > { %v710_v46 = vmul.f32 %v645_v43, %v645_v43  ;;  %v1143_v1 = vmul.u32 16, %v1127_v53  ;;  %v1128_v2 = vadd.s32 %v2381_v27, %v1108_v54  ;;  %v1129_v10 = vadd.s32 %v2381_v27, %v1109_v59 }
 0x13e   : > { %914 = vmatprep.mubr.f32.mxu0 %v708_v44  ;;  %v1157_v51 = vsub.s32 4096, %v1141_v29  ;;  %v1142_v52 = vmul.u32 16, %v1126_v48  ;;  %v1130_v26 = vadd.s32 %v2381_v27, %v1110_v20  ;;  %v1131_v28 = vadd.s32 %v2381_v27, %v1111_v33 }
 0x13f   : > { %1059 = vmatprep.mubr.f32.mxu1 %v710_v46  ;;  %915 = vmatmul.mubr.f32.gmra.mrb[62].mxu0 %v707_v45  ;;  %v1159_v15 = vsub.s32 4096, %v1143_v1  ;;  %v1144_v16 = vmul.u32 16, %v1128_v2  ;;  %v1145_v25 = vmul.u32 16, %v1129_v10 }
 0x140   : > { %1060 = vmatmul.mubr.f32.gmra.mrb[62].mxu1 %v709_v47  ;;  %v1173_v63 = vmul.u32 4, %v1157_v51  ;;  %v1158_v0 = vsub.s32 4096, %v1142_v52  ;;  %v1146_v45 = vmul.u32 16, %v1130_v26 }
 0x141   : > { %v1175_v36 = vmul.u32 4, %v1159_v15  ;;  %v1160_v37 = vsub.s32 4096, %v1144_v16  ;;  %v1161_v44 = vsub.s32 4096, %v1145_v25 }
 0x142   : > { %vm1189_vm0 = vcmp.lt.s32.totalorder %v2392_v61, %v1173_v63  ;;  %v1174_v14 = vmul.u32 4, %v1158_v0  ;;  %v1147_v63 = vmul.u32 16, %v1131_v28 }
 0x143   : > { %vm1191_vm3 = vcmp.lt.s32.totalorder %v2392_v61, %v1175_v36  ;;  %v1176_v49 = vmul.u32 4, %v1160_v37 }
 0x144   : > { %vm1190_vm2 = vcmp.lt.s32.totalorder %v2392_v61, %v1174_v14  ;;  %v1163_v16 = vsub.s32 4096, %v1147_v63 }
 0x145   : > { %vm1192_vm4 = vcmp.lt.s32.totalorder %v2392_v61, %v1176_v49 }
 0x1d6   : > { %v1502_v50 = vpop.f32.mrb[32].mxu0 }
 0x1d7   : > { %v1582_v55 = vpop.f32.mrb[32].mxu1  ;;  %v1503_v56 = vpop.f32.mrb[33].mxu0 }
 0x1d8   : > { %v1504_v57 = vadd.f32 %v1503_v56, %v1502_v50  ;;  %v1583_v58 = vpop.f32.mrb[33].mxu1  ;;  %v1112_v50 = vadd.s32 56, %v2299_v21 }
 0x1d9   : > { %v1584_v60 = vadd.f32 %v1583_v58, %v1582_v55  ;;  %v1162_v58 = vsub.s32 4096, %v1146_v45 }
 0x1da   : > { %v1505_v62 = vpop.f32.mrb[34].mxu0  ;;  %v1132_v2 = vadd.s32 %v2381_v27, %v1112_v50  ;;  %v1116_v50 = vadd.s32 88, %v2299_v21 }
 0x1db   : > { %v987_v3 = vadd.f32 %v1584_v60, %v1504_v57  ;;  %v1585_v4 = vpop.f32.mrb[34].mxu1  ;;  %v1506_v5 = vpop.f32.mrb[35].mxu0  ;;  %v1177_v57 = vmul.u32 4, %v1161_v44 }
 0x1dc   : > { %v1507_v6 = vadd.f32 %v1506_v5, %v1505_v62  ;;  %v1586_v8 = vpop.f32.mrb[35].mxu1 }
 0x1dd   : > { %v1066_v11 = vmul.f32 0.5, %v987_v3  ;;  %v1587_v12 = vadd.f32 %v1586_v8, %v1585_v4  ;;  %v1113_v3 = vadd.s32 64, %v2299_v21  ;;  %vm2429_vm5 = vcmp.lt.s32.totalorder %v2392_v61, %v1177_v57 }
 0x1de   : > { %v1508_v13 = vpop.f32.mrb[36].mxu0 }
 0x1df   : > { %v992_v17 = vadd.f32 %v1587_v12, %v1507_v6  ;;  %v1588_v18 = vpop.f32.mrb[36].mxu1  ;;  %v1509_v19 = vpop.f32.mrb[37].mxu0  ;;  %v1088_v22 = vsub.f32 %v2398_v9, %v1066_v11  ;;  %v1178_v12 = vmul.u32 4, %v1162_v58 }
 0x1e0   : > { %v1510_v23 = vadd.f32 %v1509_v19, %v1508_v13  ;;  %v1589_v24 = vpop.f32.mrb[37].mxu1  ;;  %v1148_v19 = vmul.u32 16, %v1132_v2 }
 0x1e1   : > { %v1067_v30 = vmul.f32 0.5, %v992_v17  ;;  %v1590_v31 = vadd.f32 %v1589_v24, %v1588_v18  ;;  %v2405_v32 = vsel %vm1189_vm0, %v1088_v22, -inf  ;;  %v1133_v22 = vadd.s32 %v2381_v27, %v1113_v3 }
 0x1e2   : > { %v1511_v34 = vpop.f32.mrb[38].mxu0  ;;  %v1222_v35 = vsel %vm1221_vm1, %v2405_v32, -inf  ;;  %vm2441_vm6 = vcmp.lt.s32.totalorder %v2392_v61, %v1178_v12 }
 0x1e3   : > { %v997_v38 = vadd.f32 %v1590_v31, %v1510_v23  ;;  %v1591_v39 = vpop.f32.mrb[38].mxu1  ;;  %1223 = vmax.xlane.f32.xlu0 %v1222_v35  ;;  %v1512_v40 = vpop.f32.mrb[39].mxu0  ;;  %v1089_v41 = vsub.f32 %v2398_v9, %v1067_v30  ;;  %v1114_v23 = vadd.s32 72, %v2299_v21  ;;  %v1115_v35 = vadd.s32 80, %v2299_v21 }
 0x1e4   : > { %v1513_v42 = vadd.f32 %v1512_v40, %v1511_v34  ;;  %v1592_v43 = vpop.f32.mrb[39].mxu1 }
 0x1e5   : > { %v1068_v46 = vmul.f32 0.5, %v997_v38  ;;  %v1593_v47 = vadd.f32 %v1592_v43, %v1591_v39  ;;  %v2412_v7 = vsel %vm1190_vm2, %v1089_v41, -inf  ;;  %v1179_v39 = vmul.u32 4, %v1163_v16 }
 0x1e6   : > { %v1514_v29 = vpop.f32.mrb[40].mxu0  ;;  %v1225_v48 = vsel %vm1221_vm1, %v2412_v7, -inf  ;;  %v1149_v43 = vmul.u32 16, %v1133_v22  ;;  %v1134_v44 = vadd.s32 %v2381_v27, %v1114_v23  ;;  %v1135_v49 = vadd.s32 %v2381_v27, %v1115_v35 }
 0x1e7   : > { %v1002_v51 = vadd.f32 %v1593_v47, %v1513_v42  ;;  %v1594_v52 = vpop.f32.mrb[40].mxu1  ;;  %1226 = vmax.xlane.f32.xlu0 %v1225_v48  ;;  %v1515_v53 = vpop.f32.mrb[41].mxu0  ;;  %v1090_v54 = vsub.f32 %v2398_v9, %v1068_v46  ;;  %v1164_v42 = vsub.s32 4096, %v1148_v19  ;;  %vm2461_vm7 = vcmp.lt.s32.totalorder %v2392_v61, %v1179_v39 }
 0x1e8   : > { %v1516_v55 = vadd.f32 %v1515_v53, %v1514_v29  ;;  %v1595_v56 = vpop.f32.mrb[41].mxu1  ;;  %v1165_v58 = vsub.s32 4096, %v1149_v43 }
 0x1e9   : > { %v1069_v59 = vmul.f32 0.5, %v1002_v51  ;;  %v1596_v60 = vadd.f32 %v1595_v56, %v1594_v52  ;;  %v2420_v62 = vsel %vm1191_vm3, %v1090_v54, -inf  ;;  %v1180_v57 = vmul.u32 4, %v1164_v42 }
 0x1ea   : > { %v1517_v0 = vpop.f32.mrb[42].mxu0  ;;  %v1228_v1 = vsel %vm1221_vm1, %v2420_v62, -inf }
 0x1eb   : > { %v1007_v4 = vadd.f32 %v1596_v60, %v1516_v55  ;;  %v1597_v5 = vpop.f32.mrb[42].mxu1  ;;  %1229 = vmax.xlane.f32.xlu1 %v1228_v1  ;;  %v1518_v6 = vpop.f32.mrb[43].mxu0  ;;  %v1091_v8 = vsub.f32 %v2398_v9, %v1069_v59  ;;  %v1150_v59 = vmul.u32 16, %v1134_v44  ;;  %vm1196_vm8 = vcmp.lt.s32.totalorder %v2392_v61, %v1180_v57 }
 0x1ec   : > { %v1519_v10 = vadd.f32 %v1518_v6, %v1517_v0  ;;  %v1598_v20 = vpop.f32.mrb[43].mxu1 }
 0x1ed   : > { %v1070_v13 = vmul.f32 0.5, %v1007_v4  ;;  %v1599_v14 = vadd.f32 %v1598_v20, %v1597_v5  ;;  %v2433_v15 = vsel %vm1192_vm4, %v1091_v8, -inf  ;;  %v1151_v4 = vmul.u32 16, %v1135_v49 }
 0x1ee   : > { %v1520_v17 = vpop.f32.mrb[44].mxu0  ;;  %v1231_v18 = vsel %vm1221_vm1, %v2433_v15, -inf  ;;  %v1136_v5 = vadd.s32 %v2381_v27, %v1116_v50  ;;  %v1117_v20 = vadd.s32 96, %v2299_v21 }
 0x1ef   : > { %v1012_v24 = vadd.f32 %v1599_v14, %v1519_v10  ;;  %v1600_v25 = vpop.f32.mrb[44].mxu1  ;;  %1232 = vmax.xlane.f32.xlu1 %v1231_v18  ;;  %v1521_v26 = vpop.f32.mrb[45].mxu0  ;;  %v1092_v30 = vsub.f32 %v2398_v9, %v1070_v13  ;;  %v1181_v13 = vmul.u32 4, %v1165_v58  ;;  %v1166_v14 = vsub.s32 4096, %v1150_v59 }
 0x1f0   : > { %v1522_v31 = vadd.f32 %v1521_v26, %v1520_v17  ;;  %v1601_v33 = vpop.f32.mrb[45].mxu1 }
 0x1f1   : > { %v1071_v36 = vmul.f32 0.5, %v1012_v24  ;;  %v1602_v37 = vadd.f32 %v1601_v33, %v1600_v25  ;;  %v2448_v38 = vsel %vm2429_vm5, %v1092_v30, -inf  ;;  %v1167_v24 = vsub.s32 4096, %v1151_v4 }
 0x1f2   : > { %v1523_v40 = vpop.f32.mrb[46].mxu0  ;;  %v1234_v41 = vsel %vm1221_vm1, %v2448_v38, -inf  ;;  %v1152_v25 = vmul.u32 16, %v1136_v5  ;;  %v1137_v33 = vadd.s32 %v2381_v27, %v1117_v20  ;;  %vm1197_vm9 = vcmp.lt.s32.totalorder %v2392_v61, %v1181_v13 }
 0x1f3   : > { %v1017_v45 = vadd.f32 %v1602_v37, %v1522_v31  ;;  %v1603_v46 = vpop.f32.mrb[46].mxu1  ;;  %1235 = vmax.xlane.f32.xlu0 %v1234_v41  ;;  %v1524_v47 = vpop.f32.mrb[47].mxu0  ;;  %v1093_v28 = vsub.f32 %v2398_v9, %v1071_v36  ;;  %v1182_v36 = vmul.u32 4, %v1166_v14  ;;  %v1118_v37 = vadd.s32 104, %v2299_v21 }
 0x1f4   : > { %v1525_v29 = vadd.f32 %v1524_v47, %v1523_v40  ;;  %v1604_v48 = vpop.f32.mrb[47].mxu1  ;;  %v1120_v20 = vadd.s32 120, %v2299_v21 }
 0x1f5   : > { %v1072_v51 = vmul.f32 0.5, %v1017_v45  ;;  %v1605_v52 = vadd.f32 %v1604_v48, %v1603_v46  ;;  %v2458_v53 = vsel %vm2441_vm6, %v1093_v28, -inf  ;;  %v1183_v45 = vmul.u32 4, %v1167_v24 }
 0x1f6   : > { %v1526_v55 = vpop.f32.mrb[48].mxu0  ;;  %v1237_v56 = vsel %vm1221_vm1, %v2458_v53, -inf  ;;  %v1168_v46 = vsub.s32 4096, %v1152_v25  ;;  %v1153_v48 = vmul.u32 16, %v1137_v33  ;;  %vm1198_vm10 = vcmp.lt.s32.totalorder %v2392_v61, %v1182_v36 }
 0x1f7   : > { %v1022_v60 = vadd.f32 %v1605_v52, %v1525_v29  ;;  %v1606_v63 = vpop.f32.mrb[48].mxu1  ;;  %1238 = vmax.xlane.f32.xlu1 %v1237_v56  ;;  %v1527_v0 = vpop.f32.mrb[49].mxu0  ;;  %v1094_v1 = vsub.f32 %v2398_v9, %v1072_v51  ;;  %v1138_v51 = vadd.s32 %v2381_v27, %v1118_v37  ;;  %v1119_v52 = vadd.s32 112, %v2299_v21 }
 0x1f8   : > { %v1528_v2 = vadd.f32 %v1527_v0, %v1526_v55  ;;  %v1607_v3 = vpop.f32.mrb[49].mxu1  ;;  %vm2495_vm11 = vcmp.lt.s32.totalorder %v2392_v61, %v1183_v45  ;;  %v1140_v33 = vadd.s32 %v2381_v27, %v1120_v20 }
 0x1f9   : > { %v1073_v6 = vmul.f32 0.5, %v1022_v60  ;;  %v1608_v8 = vadd.f32 %v1607_v3, %v1606_v63  ;;  %v2471_v10 = vsel %vm2461_vm7, %v1094_v1, -inf  ;;  %v1184_v63 = vmul.u32 4, %v1168_v46 }
 0x1fa   : > { %v1529_v11 = vpop.f32.mrb[50].mxu0  ;;  %v1240_v12 = vsel %vm1221_vm1, %v2471_v10, -inf  ;;  %v1169_v3 = vsub.s32 4096, %v1153_v48 }
 0x1fb   : > { %v1027_v16 = vadd.f32 %v1608_v8, %v1528_v2  ;;  %v1609_v17 = vpop.f32.mrb[50].mxu1  ;;  %1241 = vmax.xlane.f32.xlu0 %v1240_v12  ;;  %v1530_v18 = vpop.f32.mrb[51].mxu0  ;;  %v1095_v19 = vsub.f32 %v2398_v9, %v1073_v6  ;;  %v1154_v6 = vmul.u32 16, %v1138_v51  ;;  %v1139_v8 = vadd.s32 %v2381_v27, %v1119_v52 }
 0x1fc   : > { %v1531_v22 = vadd.f32 %v1530_v18, %v1529_v11  ;;  %v1610_v23 = vpop.f32.mrb[51].mxu1  ;;  %vm2507_vm12 = vcmp.lt.s32.totalorder %v2392_v61, %v1184_v63  ;;  %v1185_v21 = vmul.u32 4, %v1169_v3 }
 0x1fd   : > { %v1074_v26 = vmul.f32 0.5, %v1027_v16  ;;  %v1611_v30 = vadd.f32 %v1610_v23, %v1609_v17  ;;  %v2478_v31 = vsel %vm1196_vm8, %v1095_v19, -inf }
 0x1fe   : > { %v1532_v34 = vpop.f32.mrb[52].mxu0  ;;  %v1243_v35 = vsel %vm1221_vm1, %v2478_v31, -inf  ;;  %vm1201_vm13 = vcmp.lt.s32.totalorder %v2392_v61, %v1185_v21 }
 0x1ff   : > { %v1032_v39 = vadd.f32 %v1611_v30, %v1531_v22  ;;  %v1612_v40 = vpop.f32.mrb[52].mxu1  ;;  %1244 = vmax.xlane.f32.xlu1 %v1243_v35  ;;  %v1533_v41 = vpop.f32.mrb[53].mxu0  ;;  %v1096_v42 = vsub.f32 %v2398_v9, %v1074_v26  ;;  %v1170_v26 = vsub.s32 4096, %v1154_v6  ;;  %v1155_v30 = vmul.u32 16, %v1139_v8 }
 0x200   : > { %v1534_v43 = vadd.f32 %v1533_v41, %v1532_v34  ;;  %v1613_v44 = vpop.f32.mrb[53].mxu1 }
 0x201   : > { %v1075_v47 = vmul.f32 0.5, %v1032_v39  ;;  %v1614_v28 = vadd.f32 %v1613_v44, %v1612_v40  ;;  %v2486_v29 = vsel %vm1197_vm9, %v1096_v42, -inf  ;;  %v1186_v45 = vmul.u32 4, %v1170_v26 }
 0x202   : > { %v1535_v49 = vpop.f32.mrb[54].mxu0  ;;  %v1246_v50 = vsel %vm1221_vm1, %v2486_v29, -inf  ;;  %v1171_v46 = vsub.s32 4096, %v1155_v30 }
 0x203   : > { %v1037_v54 = vadd.f32 %v1614_v28, %v1534_v43  ;;  %v1615_v55 = vpop.f32.mrb[54].mxu1  ;;  %1247 = vmax.xlane.f32.xlu0 %v1246_v50  ;;  %v1536_v56 = vpop.f32.mrb[55].mxu0  ;;  %v1097_v57 = vsub.f32 %v2398_v9, %v1075_v47  ;;  %v1156_v47 = vmul.u32 16, %v1140_v33  ;;  %vm1202_vm14 = vcmp.lt.s32.totalorder %v2392_v61, %v1186_v45 }
 0x204   : > { %v1537_v58 = vadd.f32 %v1536_v56, %v1535_v49  ;;  %v1616_v59 = vpop.f32.mrb[55].mxu1 }
 0x205   : > { %v1076_v0 = vmul.f32 0.5, %v1037_v54  ;;  %v1617_v1 = vadd.f32 %v1616_v59, %v1615_v55  ;;  %v2499_v2 = vsel %vm1198_vm10, %v1097_v57, -inf  ;;  %v1187_v59 = vmul.u32 4, %v1171_v46 }
 0x206   : > { %v1538_v4 = vpop.f32.mrb[56].mxu0  ;;  %v1249_v5 = vsel %vm1221_vm1, %v2499_v2, -inf  ;;  %v1172_v60 = vsub.s32 4096, %v1156_v47 }
 0x207   : > { %v1042_v11 = vadd.f32 %v1617_v1, %v1537_v58  ;;  %v1618_v12 = vpop.f32.mrb[56].mxu1  ;;  %1250 = vmax.xlane.f32.xlu1 %v1249_v5  ;;  %v1539_v13 = vpop.f32.mrb[57].mxu0  ;;  %v1098_v14 = vsub.f32 %v2398_v9, %v1076_v0  ;;  %vm1203_vm15 = vcmp.lt.s32.totalorder %v2392_v61, %v1187_v59 }
 0x208   : > { %v1540_v16 = vadd.f32 %v1539_v13, %v1538_v4  ;;  %v1619_v17 = vpop.f32.mrb[57].mxu1 }
 0x209   : > { %v1077_v19 = vmul.f32 0.5, %v1042_v11  ;;  %v1620_v22 = vadd.f32 %v1619_v17, %v1618_v12  ;;  %v2513_v23 = vsel %vm2495_vm11, %v1098_v14, -inf  ;;  %v1188_v12 = vmul.u32 4, %v1172_v60 }
 0x20a   : > { %v1541_v24 = vpop.f32.mrb[58].mxu0  ;;  %v1252_v25 = vsel %vm1221_vm1, %v2513_v23, -inf }
 0x20b   : > { %v1047_v34 = vadd.f32 %v1620_v22, %v1540_v16  ;;  %v1621_v35 = vpop.f32.mrb[58].mxu1  ;;  %1253 = vmax.xlane.f32.xlu0 %v1252_v25  ;;  %v1542_v36 = vpop.f32.mrb[59].mxu0  ;;  %v1099_v37 = vsub.f32 %v2398_v9, %v1077_v19  ;;  %vm1204_vm0 = vcmp.lt.s32.totalorder %v2392_v61, %v1188_v12 }
 0x20c   : > { %v1543_v39 = vadd.f32 %v1542_v36, %v1541_v24  ;;  %v1622_v40 = vpop.f32.mrb[59].mxu1 }
 0x20d   : > { %v1078_v41 = vmul.f32 0.5, %v1047_v34  ;;  %v1623_v42 = vadd.f32 %v1622_v40, %v1621_v35  ;;  %v2521_v43 = vsel %vm2507_vm12, %v1099_v37, -inf }
 0x20e   : > { %v1544_v44 = vpop.f32.mrb[60].mxu0  ;;  %v1255_v27 = vsel %vm1221_vm1, %v2521_v43, -inf }
 0x20f   : > { %v1052_v28 = vadd.f32 %v1623_v42, %v1543_v39  ;;  %v1624_v48 = vpop.f32.mrb[60].mxu1  ;;  %1256 = vmax.xlane.f32.xlu1 %v1255_v27  ;;  %v1545_v49 = vpop.f32.mrb[61].mxu0  ;;  %v1100_v50 = vsub.f32 %v2398_v9, %v1078_v41 }
 0x210   : > { %v1546_v51 = vadd.f32 %v1545_v49, %v1544_v44  ;;  %v1625_v52 = vpop.f32.mrb[61].mxu1 }
 0x211   : > { %v1079_v54 = vmul.f32 0.5, %v1052_v28  ;;  %v1626_v55 = vadd.f32 %v1625_v52, %v1624_v48  ;;  %v2527_v56 = vsel %vm1201_vm13, %v1100_v50, -inf }
 0x212   : > { %v1547_v57 = vpop.f32.mrb[62].mxu0  ;;  %v1258_v58 = vsel %vm1221_vm1, %v2527_v56, -inf }
 0x213   : > { %v1057_v63 = vadd.f32 %v1626_v55, %v1546_v51  ;;  %v1627_v0 = vpop.f32.mrb[62].mxu1  ;;  %1259 = vmax.xlane.f32.xlu0 %v1258_v58  ;;  %v1548_v1 = vpop.f32.mrb[63].mxu0  ;;  %v1101_v3 = vsub.f32 %v2398_v9, %v1079_v54 }
 0x214   : > { %v1549_v4 = vadd.f32 %v1548_v1, %v1547_v57  ;;  %v1628_v5 = vpop.f32.mrb[63].mxu1 }
 0x215   : > { %v1080_v6 = vmul.f32 0.5, %v1057_v63  ;;  %v1629_v8 = vadd.f32 %v1628_v5, %v1627_v0  ;;  %v2533_v20 = vsel %vm1202_vm14, %v1101_v3, -inf }
 0x216   : > { %v1261_v11 = vsel %vm1221_vm1, %v2533_v20, -inf }
 0x217   : > { %v1062_v13 = vadd.f32 %v1629_v8, %v1549_v4  ;;  %1262 = vmax.xlane.f32.xlu1 %v1261_v11  ;;  %v1102_v14 = vsub.f32 %v2398_v9, %v1080_v6 }
 0x219   : > { %v1081_v16 = vmul.f32 0.5, %v1062_v13  ;;  %v2539_v17 = vsel %vm1203_vm15, %v1102_v14, -inf }
 0x21a   : > { %v1264_v18 = vsel %vm1221_vm1, %v2539_v17, -inf }
 0x21b   : > { %1265 = vmax.xlane.f32.xlu0 %v1264_v18  ;;  %v1103_v19 = vsub.f32 %v2398_v9, %v1081_v16 }
 0x21d   : > { %v2545_v22 = vsel %vm1204_vm0, %v1103_v19, -inf }
 0x21e   : > { %v1267_v21 = vsel %vm1221_vm1, %v2545_v22, -inf }
 0x21f   : > { %1268 = vmax.xlane.f32.xlu1 %v1267_v21 }
 0x270   : > { %v1224_v24 = vpop.xlane.xlu0 %1223 }
 0x274   : > { %v1227_v26 = vpop.xlane.xlu0 %1226 }
 0x278   : > { %v1230_v25 = vpop.xlane.xlu1 %1229 }
 0x27c   : > { %v1233_v30 = vpop.xlane.xlu1 %1232 }
 0x280   : > { %v1236_v33 = vpop.xlane.xlu0 %1235 }
 0x281   : > { %v1270_v44 = vmax.f32 %v1224_v24, %v1236_v33 }
 0x284   : > { %v1239_v34 = vpop.xlane.xlu1 %1238 }
 0x285   : > { %v1271_v9 = vmax.f32 %v1227_v26, %v1239_v34 }
 0x288   : > { %v1242_v35 = vpop.xlane.xlu0 %1241 }
 0x289   : > { %v1272_v27 = vmax.f32 %v1230_v25, %v1242_v35 }
 0x28c   : > { %v1245_v36 = vpop.xlane.xlu1 %1244 }
 0x28d   : > { %v1273_v45 = vmax.f32 %v1233_v30, %v1245_v36 }
 0x290   : > { %v1248_v37 = vpop.xlane.xlu0 %1247 }
 0x291   : > { %v1274_v28 = vmax.f32 %v1270_v44, %v1248_v37 }
 0x294   : > { %v1251_v39 = vpop.xlane.xlu1 %1250 }
 0x295   : > { %v1275_v46 = vmax.f32 %v1271_v9, %v1251_v39 }
 0x298   : > { %v1254_v61 = vpop.xlane.xlu0 %1253 }
 0x299   : > { %v1276_v48 = vmax.f32 %v1272_v27, %v1254_v61 }
 0x29c   : > { %v1257_v40 = vpop.xlane.xlu1 %1256 }
 0x29d   : > { %v1277_v49 = vmax.f32 %v1273_v45, %v1257_v40 }
 0x2a0   : > { %v1260_v41 = vpop.xlane.xlu0 %1259 }
 0x2a1   : > { %v1278_v52 = vmax.f32 %v1274_v28, %v1260_v41 }
 0x2a4   : > { %v1263_v42 = vpop.xlane.xlu1 %1262 }
 0x2a5   : > { %v1279_v50 = vmax.f32 %v1275_v46, %v1263_v42 }
 0x2a7   : > { %v1282_v57 = vmax.f32 %v1278_v52, %v1279_v50 }
 0x2a8   : > { %v1266_v47 = vpop.xlane.xlu0 %1265 }
 0x2a9   : > { %v1280_v54 = vmax.f32 %v1276_v48, %v1266_v47 }
 0x2ac   : > { %v1269_v51 = vpop.xlane.xlu1 %1268 }
 0x2ad   : > { %v1281_v55 = vmax.f32 %v1277_v49, %v1269_v51 }
 0x2af   : > { %v1283_v58 = vmax.f32 %v1280_v54, %v1281_v55 }
 0x2b1   : > { %v1284_v59 = vmax.f32 %v1282_v57, %v1283_v58 }
 0x2b3   : > { %v1285_v60 = vrot.slane %v1284_v59, 4 }
 0x2b5   : > { %v1286_v63 = vmax.f32 %v1284_v59, %v1285_v60 }
 0x2b7   : > { %v1287_v0 = vrot.slane %v1286_v63, 2 }
 0x2b9   : > { %v1288_v1 = vmax.f32 %v1286_v63, %v1287_v0 }
 0x2bb   : > { %v1289_v3 = vrot.slane %v1288_v1, 1 }
 0x2bd   : > { %v2549_v4 = vmax.f32 %v1288_v1, %v1289_v3 }
 0x2bf   : > { %v1292_v5 = vsub.f32 %v2412_v7, %v2549_v4  ;;  %v1291_v6 = vsub.f32 %v2405_v32, %v2549_v4  ;;  %v1294_v8 = vsub.f32 %v2433_v15, %v2549_v4  ;;  %v1293_v11 = vsub.f32 %v2420_v62, %v2549_v4 }
 0x2c0   : > { %v1296_v16 = vsub.f32 %v2458_v53, %v2549_v4  ;;  %v1295_v19 = vsub.f32 %v2448_v38, %v2549_v4  ;;  %v1298_v7 = vsub.f32 %v2478_v31, %v2549_v4  ;;  %v1297_v62 = vsub.f32 %v2471_v10, %v2549_v4 }
 0x2c1   : > { %v1309_v12 = vmul.f32 1.442695, %v1292_v5  ;;  %v1307_v13 = vmul.f32 1.442695, %v1291_v6  ;;  %v1313_v14 = vmul.f32 1.442695, %v1294_v8  ;;  %v1300_v53 = vsub.f32 %v2499_v2, %v2549_v4 }
 0x2c2   : > { %v1311_v18 = vmul.f32 1.442695, %v1293_v11  ;;  %v1317_v32 = vmul.f32 1.442695, %v1296_v16  ;;  %v1315_v15 = vmul.f32 1.442695, %v1295_v19  ;;  %v1299_v38 = vsub.f32 %v2486_v29, %v2549_v4 }
 0x2c3   : > { %1767 = vpow2.f32 %v1309_v12  ;;  %v1321_v21 = vmul.f32 1.442695, %v1298_v7  ;;  %v1319_v24 = vmul.f32 1.442695, %v1297_v62  ;;  %v1325_v26 = vmul.f32 1.442695, %v1300_v53 }
 0x2c4   : > { %1769 = vpow2.f32 %v1307_v13  ;;  %v1302_v31 = vsub.f32 %v2521_v43, %v2549_v4  ;;  %v1323_v10 = vmul.f32 1.442695, %v1299_v38  ;;  %v1301_v34 = vsub.f32 %v2513_v23, %v2549_v4 }
 0x2c5   : > { %1771 = vpow2.f32 %v1313_v14  ;;  %v1304_v37 = vsub.f32 %v2533_v20, %v2549_v4  ;;  %v1303_v61 = vsub.f32 %v2527_v56, %v2549_v4  ;;  %v1306_v42 = vsub.f32 %v2545_v22, %v2549_v4 }
 0x2c6   : > { %1773 = vpow2.f32 %v1311_v18  ;;  %v1329_v29 = vmul.f32 1.442695, %v1302_v31  ;;  %v1327_v39 = vmul.f32 1.442695, %v1301_v34  ;;  %v1305_v27 = vsub.f32 %v2539_v17, %v2549_v4 }
 0x2c7   : > { %1775 = vpow2.f32 %v1317_v32  ;;  %v1333_v9 = vmul.f32 1.442695, %v1304_v37  ;;  %v1331_v44 = vmul.f32 1.442695, %v1303_v61  ;;  %v1337_v47 = vmul.f32 1.442695, %v1306_v42 }
 0x2c8   : > { %1777 = vpow2.f32 %v1315_v15  ;;  %v1335_v48 = vmul.f32 1.442695, %v1305_v27 }
 0x2c9   : > { %1779 = vpow2.f32 %v1321_v21 }
 0x2ca   : > { %1781 = vpow2.f32 %v1319_v24 }
 0x2cb   : > { %1783 = vpow2.f32 %v1325_v26 }
 0x2cc   : > { %1785 = vpow2.f32 %v1323_v10 }
 0x2cd   : > { %v1768_v25 = vpop.eup %1767  ;;  %1787 = vpow2.f32 %v1329_v29 }
 0x2ce   : > { %v1770_v30 = vpop.eup %1769  ;;  %v1342_v33 = vsel %vm1221_vm1, %v1768_v25, 0.0  ;;  %1789 = vpow2.f32 %v1327_v39 }
 0x2cf   : > { %v1772_v2 = vpop.eup %1771  ;;  %1343 = vadd.xlane.f32.xlu1 %v1342_v33  ;;  %v1339_v35 = vsel %vm1221_vm1, %v1770_v30, 0.0  ;;  %1791 = vpow2.f32 %v1333_v9 }
 0x2d0   : > { %v1774_v36 = vpop.eup %1773  ;;  %1340 = vadd.xlane.f32.xlu0 %v1339_v35  ;;  %v1348_v43 = vsel %vm1221_vm1, %v1772_v2, 0.0  ;;  %1793 = vpow2.f32 %v1331_v44 }
 0x2d1   : > { %v1776_v40 = vpop.eup %1775  ;;  %v1345_v23 = vsel %vm1221_vm1, %v1774_v36, 0.0  ;;  %1795 = vpow2.f32 %v1337_v47 }
 0x2d2   : > { %v1778_v41 = vpop.eup %1777  ;;  %v1354_v20 = vsel %vm1221_vm1, %v1776_v40, 0.0  ;;  %1797 = vpow2.f32 %v1335_v48 }
 0x2d3   : > { %1349 = vadd.xlane.f32.xlu1 %v1348_v43  ;;  %v1780_v45 = vpop.eup %1779  ;;  %v1351_v56 = vsel %vm1221_vm1, %v1778_v41, 0.0 }
 0x2d4   : > { %1346 = vadd.xlane.f32.xlu0 %v1345_v23  ;;  %v1782_v46 = vpop.eup %1781  ;;  %v1360_v28 = vsel %vm1221_vm1, %v1780_v45, 0.0 }
 0x2d5   : > { %v1784_v22 = vpop.eup %1783  ;;  %v1357_v49 = vsel %vm1221_vm1, %v1782_v46, 0.0 }
 0x2d6   : > { %v1786_v50 = vpop.eup %1785  ;;  %v1366_v17 = vsel %vm1221_vm1, %v1784_v22, 0.0 }
 0x2d7   : > { %1355 = vadd.xlane.f32.xlu1 %v1354_v20  ;;  %v1788_v51 = vpop.eup %1787  ;;  %v1363_v52 = vsel %vm1221_vm1, %v1786_v50, 0.0 }
 0x2d8   : > { %1352 = vadd.xlane.f32.xlu0 %v1351_v56  ;;  %v1790_v54 = vpop.eup %1789  ;;  %v1372_v55 = vsel %vm1221_vm1, %v1788_v51, 0.0 }
 0x2d9   : > { %v1792_v57 = vpop.eup %1791  ;;  %v1369_v58 = vsel %vm1221_vm1, %v1790_v54, 0.0 }
 0x2da   : > { %v1794_v59 = vpop.eup %1793  ;;  %v1378_v60 = vsel %vm1221_vm1, %v1792_v57, 0.0 }
 0x2db   : > { %1361 = vadd.xlane.f32.xlu1 %v1360_v28  ;;  %v1796_v63 = vpop.eup %1795  ;;  %v1375_v0 = vsel %vm1221_vm1, %v1794_v59, 0.0 }
 0x2dc   : > { %1358 = vadd.xlane.f32.xlu0 %v1357_v49  ;;  %v1798_v1 = vpop.eup %1797  ;;  %v1384_v3 = vsel %vm1221_vm1, %v1796_v63, 0.0 }
 0x2dd   : > { %v1381_v5 = vsel %vm1221_vm1, %v1798_v1, 0.0 }
 0x2df   : > { %1367 = vadd.xlane.f32.xlu1 %v1366_v17 }
 0x2e0   : > { %1364 = vadd.xlane.f32.xlu0 %v1363_v52 }
 0x2e3   : > { %1373 = vadd.xlane.f32.xlu1 %v1372_v55 }
 0x2e4   : > { %1370 = vadd.xlane.f32.xlu0 %v1369_v58 }
 0x2e7   : > { %1379 = vadd.xlane.f32.xlu1 %v1378_v60 }
 0x2e8   : > { %1376 = vadd.xlane.f32.xlu0 %v1375_v0 }
 0x2eb   : > { %1385 = vadd.xlane.f32.xlu1 %v1384_v3 }
 0x2ec   : > { %1382 = vadd.xlane.f32.xlu0 %v1381_v5 }
 0x35c   : > { %v1344_v6 = vpop.xlane.xlu1 %1343 }
 0x35d   : > { %v1341_v8 = vpop.xlane.xlu0 %1340 }
 0x35e   : > { %v1387_v11 = vadd.f32 %v1344_v6, %v1341_v8 }
 0x360   : > { %v1350_v12 = vpop.xlane.xlu1 %1349 }
 0x361   : > { %v1347_v13 = vpop.xlane.xlu0 %1346 }
 0x362   : > { %v1388_v14 = vadd.f32 %v1387_v11, %v1347_v13 }
 0x364   : > { %v1356_v16 = vpop.xlane.xlu1 %1355  ;;  %v1389_v18 = vadd.f32 %v1388_v14, %v1350_v12 }
 0x365   : > { %v1353_v19 = vpop.xlane.xlu0 %1352 }
 0x366   : > { %v1390_v32 = vadd.f32 %v1389_v18, %v1353_v19 }
 0x368   : > { %v1362_v7 = vpop.xlane.xlu1 %1361  ;;  %v1391_v15 = vadd.f32 %v1390_v32, %v1356_v16 }
 0x369   : > { %v1359_v62 = vpop.xlane.xlu0 %1358 }
 0x36a   : > { %v1392_v21 = vadd.f32 %v1391_v15, %v1359_v62 }
 0x36c   : > { %v1368_v53 = vpop.xlane.xlu1 %1367  ;;  %v1393_v24 = vadd.f32 %v1392_v21, %v1362_v7 }
 0x36d   : > { %v1365_v38 = vpop.xlane.xlu0 %1364 }
 0x36e   : > { %v1394_v25 = vadd.f32 %v1393_v24, %v1365_v38 }
 0x370   : > { %v1374_v26 = vpop.xlane.xlu1 %1373  ;;  %v1395_v31 = vadd.f32 %v1394_v25, %v1368_v53 }
 0x371   : > { %v1371_v30 = vpop.xlane.xlu0 %1370 }
 0x372   : > { %v1396_v33 = vadd.f32 %v1395_v31, %v1371_v30 }
 0x374   : > { %v1397_v10 = vadd.f32 %v1396_v33, %v1374_v26  ;;  %v1380_v34 = vpop.xlane.xlu1 %1379 }
 0x375   : > { %v1377_v2 = vpop.xlane.xlu0 %1376 }
 0x376   : > { %v1398_v35 = vadd.f32 %v1397_v10, %v1377_v2 }
 0x378   : > { %v1399_v36 = vadd.f32 %v1398_v35, %v1380_v34  ;;  %v1386_v43 = vpop.xlane.xlu1 %1385 }
 0x379   : > { %v1383_v29 = vpop.xlane.xlu0 %1382 }
 0x37a   : > { %v1400_v37 = vadd.f32 %v1399_v36, %v1383_v29 }
 0x37c   : > { %v1401_v39 = vadd.f32 %v1400_v37, %v1386_v43 }
 0x37e   : > { %v1402_v61 = vrot.slane %v1401_v39, 4 }
 0x380   : > { %v1403_v40 = vadd.f32 %v1402_v61, %v1401_v39 }
 0x382   : > { %v1404_v23 = vrot.slane %v1403_v40, 2 }
 0x384   : > { %v1405_v41 = vadd.f32 %v1404_v23, %v1403_v40 }
 0x386   : > { %v1406_v9 = vrot.slane %v1405_v41, 1 }
 0x388   : > { %v1407_v42 = vadd.f32 %v1406_v9, %v1405_v41 }
 0x38a   : > { %1799 = vlog2.f32 %v1407_v42 }
 0x394   : > { %v1800_v20 = vpop.eup %1799 }
 0x395   : > { %v1409_v44 = vmul.f32 0.6931472, %v1800_v20 }
 0x397   : > { %v1410_v27 = vadd.f32 %v1409_v44, %v2549_v4 }
 0x399   : > { %1411 = vst [vmem:[%s222_s17] sm:$0x1] %v1410_v27 }
 0x39a PF: > { %s15_s18 = sadd.s32 1, %s1807_s18  }
 0x39b   : > { %p12_p5 = scmp.ge.s32.totalorder %s15_s18, 4  }
 0x39d   :  { %14 = sbr.rel (!%p12_p5) target bundleno = 1 (0x1), region = 70 }

</bundles_post_ra>
